<compile_context>
chip_gen: v7x
topology: tpu7x:2x2x1
jax: 0.10.0
libtpu: 0.0.40
codegen_flags: <defaults>
</compile_context>

<pallas_src>
import jax
import jax.numpy as jnp
from jax.experimental import pallas as pl
from jax.experimental.pallas import tpu as pltpu


# ----------------------------------------------------------------------------
# Fused kernel: conv-as-matmul -> sigmoid -> input projection -> LSTM -> fc
# ----------------------------------------------------------------------------
def clstm_kernel(x2col_ref, convw_ref, convb_ref, wih_ref, whh_ref,
                 lstmb_ref, fcw_ref, fcb_ref, out_ref):
    # x2col_ref: (T*B, F*E) bf16  im2col'd sigmoid(embedding), built in wrapper
    # convw_ref: (F*E, NF)  bf16  conv weight, im2col layout (tap-major rows)
    # convb_ref: (1, NF)    f32
    # wih_ref:   (NF, 4H)   bf16  packed input->gate weights, order (i, f, g, o)
    # whh_ref:   (H, 4H)    bf16  packed hidden->gate weights
    # lstmb_ref: (1, 4H)    f32   b_ih + b_hh folded
    # fcw_ref:   (H, O)     f32   fc weight (pre-transposed)
    # fcb_ref:   (1, O)     f32
    # out_ref:   (B, O)     f32   fc(last hidden state)
    TB, FE = x2col_ref.shape
    NF = convw_ref.shape[1]
    H, H4 = whh_ref.shape
    B, O = out_ref.shape
    T = TB // B

    # ---- conv as ONE matmul: (T*B, F*E) x (F*E, NF), bf16 operands, f32 acc --
    conv_feat = jax.nn.sigmoid(
        jnp.dot(x2col_ref[...], convw_ref[...],
                preferred_element_type=jnp.float32)
        + convb_ref[...])                                # (T*B, NF), f32

    # ---- input projection hoisted out of the recurrence ---------------------
    # Stays a traced value (~4 vregs); no VMEM scratch round trip.
    xw = (jnp.dot(conv_feat.astype(jnp.bfloat16), wih_ref[...],
                  preferred_element_type=jnp.float32)
          + lstmb_ref[...])                              # (T*B, 4H), lane-dense

    whh = whh_ref[...]                                   # bf16, loop-invariant

    # ---- LSTM recurrence: one bf16 (B,H)x(H,4H) matmul per step --------------
    h = jnp.zeros((B, H), jnp.float32)
    c = jnp.zeros((B, H), jnp.float32)
    for t in range(T):                                   # T static & small
        gates = xw[t * B:(t + 1) * B, :] + jnp.dot(
            h.astype(jnp.bfloat16), whh, preferred_element_type=jnp.float32)
        # full-width transcendentals on (B, 4H), then slice (2 EUP pushes/step)
        sig = jax.nn.sigmoid(gates)
        th = jnp.tanh(gates)
        i_g = sig[:, 0 * H:1 * H]
        f_g = sig[:, 1 * H:2 * H]
        g_g = th[:, 2 * H:3 * H]
        o_g = sig[:, 3 * H:4 * H]
        c = f_g * c + i_g * g_g
        h = o_g * jnp.tanh(c)

    # ---- final fully-connected layer on the last hidden state ---------------
    out_ref[...] = (jnp.dot(h, fcw_ref[...], preferred_element_type=jnp.float32)
                    + fcb_ref[...])


# ----------------------------------------------------------------------------
# Wrapper: embedding gather + im2col in XLA, everything else in the kernel
# ----------------------------------------------------------------------------
def clstm_forward(tokens, kparams):
    # sig_table already has sigmoid folded in (done once at packing time).
    emb_t = jnp.take(kparams["sig_table"], tokens.T, axis=0)   # (L, B, E) f32

    L, B, E = emb_t.shape
    FE, NF = kparams["conv_w"].shape
    F = FE // E
    T = L - F + 1
    H = kparams["lstm_whh"].shape[0]
    O = kparams["fc_w"].shape[-1]

    # im2col in XLA: (T, B, F*E) with tap-major columns, flattened to rows.
    x2col = jnp.concatenate([emb_t[f:f + T] for f in range(F)], axis=-1)
    x2col = x2col.reshape(T * B, FE).astype(jnp.bfloat16)       # (T*B, F*E)

    return pl.pallas_call(
        clstm_kernel,
        out_shape=jax.ShapeDtypeStruct((B, O), jnp.float32),
        in_specs=[pl.BlockSpec(memory_space=pltpu.MemorySpace.VMEM)] * 8,
        out_specs=pl.BlockSpec(memory_space=pltpu.MemorySpace.VMEM),
    )(x2col, kparams["conv_w"], kparams["conv_b"], kparams["lstm_wih"],
      kparams["lstm_whh"], kparams["lstm_b"], kparams["fc_w"], kparams["fc_b"])


# ----------------------------------------------------------------------------
# Pure-JAX f32 reference (same packed layouts) for tolerance validation
# ----------------------------------------------------------------------------
def clstm_ref(tokens, p):
    table = jax.nn.sigmoid(p["embedding"])
    emb_t = jnp.take(table, tokens.T, axis=0)                   # (L, B, E)
    L, B, E = emb_t.shape
    FE, NF = p["conv_w"].shape
    F = FE // E
    T = L - F + 1
    H = p["lstm_whh"].shape[0]

    x2col = jnp.concatenate([emb_t[f:f + T] for f in range(F)], axis=-1)
    x2col = x2col.reshape(T * B, FE)
    conv_feat = jax.nn.sigmoid(x2col @ p["conv_w"] + p["conv_b"])
    xw = (conv_feat @ p["lstm_wih"] + p["lstm_b"]).reshape(T, B, 4 * H)

    h = jnp.zeros((B, H), jnp.float32)
    c = jnp.zeros((B, H), jnp.float32)
    for t in range(T):
        g = xw[t] + h @ p["lstm_whh"]
        i_g = jax.nn.sigmoid(g[:, 0 * H:1 * H])
        f_g = jax.nn.sigmoid(g[:, 1 * H:2 * H])
        g_g = jnp.tanh(g[:, 2 * H:3 * H])
        o_g = jax.nn.sigmoid(g[:, 3 * H:4 * H])
        c = f_g * c + i_g * g_g
        h = o_g * jnp.tanh(c)
    return h @ p["fc_w"] + p["fc_b"]


# ----------------------------------------------------------------------------
# Parameter init (f32 canonical, kernel-friendly packed layouts) + bf16 packing
# ----------------------------------------------------------------------------
def init_params(key, vocab_size, embedding_dim, n_filters, filter_size,
                hidden, output_dim):
    ks = jax.random.split(key, 8)

    def u(k, shape, scale):
        return jax.random.uniform(k, shape, jnp.float32, -scale, scale)

    emb = jax.random.normal(ks[0], (vocab_size, embedding_dim), jnp.float32)
    kc = 1.0 / (filter_size * embedding_dim) ** 0.5
    # conv weight in im2col layout: row index = tap * E + e  (tap-major)
    conv_w = u(ks[1], (filter_size, embedding_dim, n_filters), kc)
    conv_w = conv_w.reshape(filter_size * embedding_dim, n_filters)
    conv_b = u(ks[2], (1, n_filters), kc)
    kl = 1.0 / hidden ** 0.5
    # packed LSTM gates, order (i, f, g, o) along the last (4H) axis
    lstm_wih = u(ks[3], (n_filters, 4 * hidden), kl)
    lstm_whh = u(ks[4], (hidden, 4 * hidden), kl)
    lstm_b = u(ks[5], (1, 4 * hidden), kl)        # b_ih + b_hh folded together
    fc_w = u(ks[6], (hidden, output_dim), kl)
    fc_b = u(ks[7], (1, output_dim), kl)
    return dict(embedding=emb, conv_w=conv_w, conv_b=conv_b,
                lstm_wih=lstm_wih, lstm_whh=lstm_whh, lstm_b=lstm_b,
                fc_w=fc_w, fc_b=fc_b)


def pack_params(p):
    # One-time packing: fold sigmoid into the embedding table, pre-cast the
    # matmul weights to bf16 (no per-call converts, half the weight DMA bytes).
    return dict(
        sig_table=jax.nn.sigmoid(p["embedding"]),
        conv_w=p["conv_w"].astype(jnp.bfloat16),
        conv_b=p["conv_b"],
        lstm_wih=p["lstm_wih"].astype(jnp.bfloat16),
        lstm_whh=p["lstm_whh"].astype(jnp.bfloat16),
        lstm_b=p["lstm_b"],
        fc_w=p["fc_w"],
        fc_b=p["fc_b"],
    )


# TODO(synk): dropout layers are inference no-ops, relu/maxpool are declared
# but unused by the intended C-LSTM pipeline, and the per-layer `self.outputs`
# / alpha ensemble logic in the original forward() is non-executable as
# written; they are intentionally not faked here.

if __name__ == "__main__":
    # Small shapes consistent with the module's __init__:
    vocab_size = 101          # len(string.printable) + 1
    embedding_dim = 32
    n_filters = 16
    filter_size = 3
    hidden = 32               # max_num_hidden_layers (LSTM hidden size); 4H=128
    output_dim = 2            # n_classes
    batch, seq_len = 2, 16

    key = jax.random.PRNGKey(0)
    k_tok, k_par = jax.random.split(key)
    tokens = jax.random.randint(k_tok, (batch, seq_len), 0, vocab_size,
                                dtype=jnp.int32)
    params = init_params(k_par, vocab_size, embedding_dim, n_filters,
                         filter_size, hidden, output_dim)
    kparams = pack_params(params)

    out = jax.jit(clstm_forward)(tokens, kparams)
    jax.block_until_ready(out)
    assert out.shape == (batch, output_dim)

    # Tolerance check against the pure-JAX f32 reference (bf16 drift bound).
    ref = clstm_ref(tokens, params)
    assert jnp.allclose(out, ref, atol=3e-2, rtol=3e-2), (out, ref)

    print("KERNEL_OK")
</pallas_src>

<mosaic_0001>
module attributes {stable_mosaic.version = 11 : i64} {
  func.func @clstm_kernel(%arg0: memref<28x96xbf16, #tpu.memory_space<vmem>>, %arg1: memref<96x16xbf16, #tpu.memory_space<vmem>>, %arg2: memref<1x16xf32, #tpu.memory_space<vmem>>, %arg3: memref<16x128xbf16, #tpu.memory_space<vmem>>, %arg4: memref<32x128xbf16, #tpu.memory_space<vmem>>, %arg5: memref<1x128xf32, #tpu.memory_space<vmem>>, %arg6: memref<32x2xf32, #tpu.memory_space<vmem>>, %arg7: memref<1x2xf32, #tpu.memory_space<vmem>>, %arg8: memref<2x2xf32, #tpu.memory_space<vmem>>) attributes {dimension_semantics = [], scalar_prefetch = 0 : i64, scratch_operands = 0 : i64, tpu.core_type = #tpu.core_type<tc>} {
    %c0 = arith.constant 0 : index
    %c0_0 = arith.constant 0 : index
    %0 = vector.load %arg0[%c0, %c0_0] : memref<28x96xbf16, #tpu.memory_space<vmem>>, vector<28x96xbf16>
    %c0_1 = arith.constant 0 : index
    %c0_2 = arith.constant 0 : index
    %1 = vector.load %arg1[%c0_1, %c0_2] : memref<96x16xbf16, #tpu.memory_space<vmem>>, vector<96x16xbf16>
    %cst = arith.constant dense<0.000000e+00> : vector<28x16xf32>
    %2 = tpu.matmul %0, %1, %cst {dimension_numbers = #tpu.dot_dimension_numbers<[1], [0], [0], [1], [0, 0, 1, 1], [], []>} : vector<28x96xbf16>, vector<96x16xbf16>, vector<28x16xf32> -> vector<28x16xf32>
    %c0_3 = arith.constant 0 : index
    %c0_4 = arith.constant 0 : index
    %3 = vector.load %arg2[%c0_3, %c0_4] : memref<1x16xf32, #tpu.memory_space<vmem>>, vector<1x16xf32>
    %4 = vector.broadcast %3 : vector<1x16xf32> to vector<28x16xf32>
    %5 = arith.addf %2, %4 : vector<28x16xf32>
    %6 = arith.negf %5 : vector<28x16xf32>
    %7 = math.exp %6 : vector<28x16xf32>
    %cst_5 = arith.constant 1.000000e+00 : f32
    %8 = vector.broadcast %cst_5 : f32 to vector<28x16xf32>
    %9 = arith.addf %8, %7 : vector<28x16xf32>
    %10 = arith.divf %8, %9 : vector<28x16xf32>
    %11 = arith.truncf %10 : vector<28x16xf32> to vector<28x16xbf16>
    %c0_6 = arith.constant 0 : index
    %c0_7 = arith.constant 0 : index
    %12 = vector.load %arg3[%c0_6, %c0_7] : memref<16x128xbf16, #tpu.memory_space<vmem>>, vector<16x128xbf16>
    %cst_8 = arith.constant dense<0.000000e+00> : vector<28x128xf32>
    %13 = tpu.matmul %11, %12, %cst_8 {dimension_numbers = #tpu.dot_dimension_numbers<[1], [0], [0], [1], [0, 0, 1, 1], [], []>} : vector<28x16xbf16>, vector<16x128xbf16>, vector<28x128xf32> -> vector<28x128xf32>
    %c0_9 = arith.constant 0 : index
    %c0_10 = arith.constant 0 : index
    %14 = vector.load %arg5[%c0_9, %c0_10] : memref<1x128xf32, #tpu.memory_space<vmem>>, vector<1x128xf32>
    %15 = vector.broadcast %14 : vector<1x128xf32> to vector<28x128xf32>
    %16 = arith.addf %13, %15 : vector<28x128xf32>
    %c0_11 = arith.constant 0 : index
    %c0_12 = arith.constant 0 : index
    %17 = vector.load %arg4[%c0_11, %c0_12] : memref<32x128xbf16, #tpu.memory_space<vmem>>, vector<32x128xbf16>
    %cst_13 = arith.constant 0.000000e+00 : f32
    %18 = vector.broadcast %cst_13 : f32 to vector<2x32xf32>
    %cst_14 = arith.constant 0.000000e+00 : f32
    %19 = vector.broadcast %cst_14 : f32 to vector<2x32xf32>
    %20 = vector.extract_strided_slice %16 {offsets = [0, 0], sizes = [2, 128], strides = [1, 1]} : vector<28x128xf32> to vector<2x128xf32>
    %21 = arith.truncf %18 : vector<2x32xf32> to vector<2x32xbf16>
    %cst_15 = arith.constant dense<0.000000e+00> : vector<2x128xf32>
    %22 = tpu.matmul %21, %17, %cst_15 {dimension_numbers = #tpu.dot_dimension_numbers<[1], [0], [0], [1], [0, 0, 1, 1], [], []>} : vector<2x32xbf16>, vector<32x128xbf16>, vector<2x128xf32> -> vector<2x128xf32>
    %23 = arith.addf %20, %22 : vector<2x128xf32>
    %24 = arith.negf %23 : vector<2x128xf32>
    %25 = math.exp %24 : vector<2x128xf32>
    %cst_16 = arith.constant 1.000000e+00 : f32
    %26 = vector.broadcast %cst_16 : f32 to vector<2x128xf32>
    %27 = arith.addf %26, %25 : vector<2x128xf32>
    %28 = arith.divf %26, %27 : vector<2x128xf32>
    %29 = math.tanh %23 : vector<2x128xf32>
    %30 = vector.extract_strided_slice %28 {offsets = [0, 0], sizes = [2, 32], strides = [1, 1]} : vector<2x128xf32> to vector<2x32xf32>
    %31 = vector.extract_strided_slice %28 {offsets = [0, 32], sizes = [2, 32], strides = [1, 1]} : vector<2x128xf32> to vector<2x32xf32>
    %32 = vector.extract_strided_slice %29 {offsets = [0, 64], sizes = [2, 32], strides = [1, 1]} : vector<2x128xf32> to vector<2x32xf32>
    %33 = vector.extract_strided_slice %28 {offsets = [0, 96], sizes = [2, 32], strides = [1, 1]} : vector<2x128xf32> to vector<2x32xf32>
    %34 = arith.mulf %31, %19 : vector<2x32xf32>
    %35 = arith.mulf %30, %32 : vector<2x32xf32>
    %36 = arith.addf %34, %35 : vector<2x32xf32>
    %37 = math.tanh %36 : vector<2x32xf32>
    %38 = arith.mulf %33, %37 : vector<2x32xf32>
    %39 = vector.extract_strided_slice %16 {offsets = [2, 0], sizes = [2, 128], strides = [1, 1]} : vector<28x128xf32> to vector<2x128xf32>
    %40 = arith.truncf %38 : vector<2x32xf32> to vector<2x32xbf16>
    %cst_17 = arith.constant dense<0.000000e+00> : vector<2x128xf32>
    %41 = tpu.matmul %40, %17, %cst_17 {dimension_numbers = #tpu.dot_dimension_numbers<[1], [0], [0], [1], [0, 0, 1, 1], [], []>} : vector<2x32xbf16>, vector<32x128xbf16>, vector<2x128xf32> -> vector<2x128xf32>
    %42 = arith.addf %39, %41 : vector<2x128xf32>
    %43 = arith.negf %42 : vector<2x128xf32>
    %44 = math.exp %43 : vector<2x128xf32>
    %cst_18 = arith.constant 1.000000e+00 : f32
    %45 = vector.broadcast %cst_18 : f32 to vector<2x128xf32>
    %46 = arith.addf %45, %44 : vector<2x128xf32>
    %47 = arith.divf %45, %46 : vector<2x128xf32>
    %48 = math.tanh %42 : vector<2x128xf32>
    %49 = vector.extract_strided_slice %47 {offsets = [0, 0], sizes = [2, 32], strides = [1, 1]} : vector<2x128xf32> to vector<2x32xf32>
    %50 = vector.extract_strided_slice %47 {offsets = [0, 32], sizes = [2, 32], strides = [1, 1]} : vector<2x128xf32> to vector<2x32xf32>
    %51 = vector.extract_strided_slice %48 {offsets = [0, 64], sizes = [2, 32], strides = [1, 1]} : vector<2x128xf32> to vector<2x32xf32>
    %52 = vector.extract_strided_slice %47 {offsets = [0, 96], sizes = [2, 32], strides = [1, 1]} : vector<2x128xf32> to vector<2x32xf32>
    %53 = arith.mulf %50, %36 : vector<2x32xf32>
    %54 = arith.mulf %49, %51 : vector<2x32xf32>
    %55 = arith.addf %53, %54 : vector<2x32xf32>
    %56 = math.tanh %55 : vector<2x32xf32>
    %57 = arith.mulf %52, %56 : vector<2x32xf32>
    %58 = vector.extract_strided_slice %16 {offsets = [4, 0], sizes = [2, 128], strides = [1, 1]} : vector<28x128xf32> to vector<2x128xf32>
    %59 = arith.truncf %57 : vector<2x32xf32> to vector<2x32xbf16>
    %cst_19 = arith.constant dense<0.000000e+00> : vector<2x128xf32>
    %60 = tpu.matmul %59, %17, %cst_19 {dimension_numbers = #tpu.dot_dimension_numbers<[1], [0], [0], [1], [0, 0, 1, 1], [], []>} : vector<2x32xbf16>, vector<32x128xbf16>, vector<2x128xf32> -> vector<2x128xf32>
    %61 = arith.addf %58, %60 : vector<2x128xf32>
    %62 = arith.negf %61 : vector<2x128xf32>
    %63 = math.exp %62 : vector<2x128xf32>
    %cst_20 = arith.constant 1.000000e+00 : f32
    %64 = vector.broadcast %cst_20 : f32 to vector<2x128xf32>
    %65 = arith.addf %64, %63 : vector<2x128xf32>
    %66 = arith.divf %64, %65 : vector<2x128xf32>
    %67 = math.tanh %61 : vector<2x128xf32>
    %68 = vector.extract_strided_slice %66 {offsets = [0, 0], sizes = [2, 32], strides = [1, 1]} : vector<2x128xf32> to vector<2x32xf32>
    %69 = vector.extract_strided_slice %66 {offsets = [0, 32], sizes = [2, 32], strides = [1, 1]} : vector<2x128xf32> to vector<2x32xf32>
    %70 = vector.extract_strided_slice %67 {offsets = [0, 64], sizes = [2, 32], strides = [1, 1]} : vector<2x128xf32> to vector<2x32xf32>
    %71 = vector.extract_strided_slice %66 {offsets = [0, 96], sizes = [2, 32], strides = [1, 1]} : vector<2x128xf32> to vector<2x32xf32>
    %72 = arith.mulf %69, %55 : vector<2x32xf32>
    %73 = arith.mulf %68, %70 : vector<2x32xf32>
    %74 = arith.addf %72, %73 : vector<2x32xf32>
    %75 = math.tanh %74 : vector<2x32xf32>
    %76 = arith.mulf %71, %75 : vector<2x32xf32>
    %77 = vector.extract_strided_slice %16 {offsets = [6, 0], sizes = [2, 128], strides = [1, 1]} : vector<28x128xf32> to vector<2x128xf32>
    %78 = arith.truncf %76 : vector<2x32xf32> to vector<2x32xbf16>
    %cst_21 = arith.constant dense<0.000000e+00> : vector<2x128xf32>
    %79 = tpu.matmul %78, %17, %cst_21 {dimension_numbers = #tpu.dot_dimension_numbers<[1], [0], [0], [1], [0, 0, 1, 1], [], []>} : vector<2x32xbf16>, vector<32x128xbf16>, vector<2x128xf32> -> vector<2x128xf32>
    %80 = arith.addf %77, %79 : vector<2x128xf32>
    %81 = arith.negf %80 : vector<2x128xf32>
    %82 = math.exp %81 : vector<2x128xf32>
    %cst_22 = arith.constant 1.000000e+00 : f32
    %83 = vector.broadcast %cst_22 : f32 to vector<2x128xf32>
    %84 = arith.addf %83, %82 : vector<2x128xf32>
    %85 = arith.divf %83, %84 : vector<2x128xf32>
    %86 = math.tanh %80 : vector<2x128xf32>
    %87 = vector.extract_strided_slice %85 {offsets = [0, 0], sizes = [2, 32], strides = [1, 1]} : vector<2x128xf32> to vector<2x32xf32>
    %88 = vector.extract_strided_slice %85 {offsets = [0, 32], sizes = [2, 32], strides = [1, 1]} : vector<2x128xf32> to vector<2x32xf32>
    %89 = vector.extract_strided_slice %86 {offsets = [0, 64], sizes = [2, 32], strides = [1, 1]} : vector<2x128xf32> to vector<2x32xf32>
    %90 = vector.extract_strided_slice %85 {offsets = [0, 96], sizes = [2, 32], strides = [1, 1]} : vector<2x128xf32> to vector<2x32xf32>
    %91 = arith.mulf %88, %74 : vector<2x32xf32>
    %92 = arith.mulf %87, %89 : vector<2x32xf32>
    %93 = arith.addf %91, %92 : vector<2x32xf32>
    %94 = math.tanh %93 : vector<2x32xf32>
    %95 = arith.mulf %90, %94 : vector<2x32xf32>
    %96 = vector.extract_strided_slice %16 {offsets = [8, 0], sizes = [2, 128], strides = [1, 1]} : vector<28x128xf32> to vector<2x128xf32>
    %97 = arith.truncf %95 : vector<2x32xf32> to vector<2x32xbf16>
    %cst_23 = arith.constant dense<0.000000e+00> : vector<2x128xf32>
    %98 = tpu.matmul %97, %17, %cst_23 {dimension_numbers = #tpu.dot_dimension_numbers<[1], [0], [0], [1], [0, 0, 1, 1], [], []>} : vector<2x32xbf16>, vector<32x128xbf16>, vector<2x128xf32> -> vector<2x128xf32>
    %99 = arith.addf %96, %98 : vector<2x128xf32>
    %100 = arith.negf %99 : vector<2x128xf32>
    %101 = math.exp %100 : vector<2x128xf32>
    %cst_24 = arith.constant 1.000000e+00 : f32
    %102 = vector.broadcast %cst_24 : f32 to vector<2x128xf32>
    %103 = arith.addf %102, %101 : vector<2x128xf32>
    %104 = arith.divf %102, %103 : vector<2x128xf32>
    %105 = math.tanh %99 : vector<2x128xf32>
    %106 = vector.extract_strided_slice %104 {offsets = [0, 0], sizes = [2, 32], strides = [1, 1]} : vector<2x128xf32> to vector<2x32xf32>
    %107 = vector.extract_strided_slice %104 {offsets = [0, 32], sizes = [2, 32], strides = [1, 1]} : vector<2x128xf32> to vector<2x32xf32>
    %108 = vector.extract_strided_slice %105 {offsets = [0, 64], sizes = [2, 32], strides = [1, 1]} : vector<2x128xf32> to vector<2x32xf32>
    %109 = vector.extract_strided_slice %104 {offsets = [0, 96], sizes = [2, 32], strides = [1, 1]} : vector<2x128xf32> to vector<2x32xf32>
    %110 = arith.mulf %107, %93 : vector<2x32xf32>
    %111 = arith.mulf %106, %108 : vector<2x32xf32>
    %112 = arith.addf %110, %111 : vector<2x32xf32>
    %113 = math.tanh %112 : vector<2x32xf32>
    %114 = arith.mulf %109, %113 : vector<2x32xf32>
    %115 = vector.extract_strided_slice %16 {offsets = [10, 0], sizes = [2, 128], strides = [1, 1]} : vector<28x128xf32> to vector<2x128xf32>
    %116 = arith.truncf %114 : vector<2x32xf32> to vector<2x32xbf16>
    %cst_25 = arith.constant dense<0.000000e+00> : vector<2x128xf32>
    %117 = tpu.matmul %116, %17, %cst_25 {dimension_numbers = #tpu.dot_dimension_numbers<[1], [0], [0], [1], [0, 0, 1, 1], [], []>} : vector<2x32xbf16>, vector<32x128xbf16>, vector<2x128xf32> -> vector<2x128xf32>
    %118 = arith.addf %115, %117 : vector<2x128xf32>
    %119 = arith.negf %118 : vector<2x128xf32>
    %120 = math.exp %119 : vector<2x128xf32>
    %cst_26 = arith.constant 1.000000e+00 : f32
    %121 = vector.broadcast %cst_26 : f32 to vector<2x128xf32>
    %122 = arith.addf %121, %120 : vector<2x128xf32>
    %123 = arith.divf %121, %122 : vector<2x128xf32>
    %124 = math.tanh %118 : vector<2x128xf32>
    %125 = vector.extract_strided_slice %123 {offsets = [0, 0], sizes = [2, 32], strides = [1, 1]} : vector<2x128xf32> to vector<2x32xf32>
    %126 = vector.extract_strided_slice %123 {offsets = [0, 32], sizes = [2, 32], strides = [1, 1]} : vector<2x128xf32> to vector<2x32xf32>
    %127 = vector.extract_strided_slice %124 {offsets = [0, 64], sizes = [2, 32], strides = [1, 1]} : vector<2x128xf32> to vector<2x32xf32>
    %128 = vector.extract_strided_slice %123 {offsets = [0, 96], sizes = [2, 32], strides = [1, 1]} : vector<2x128xf32> to vector<2x32xf32>
    %129 = arith.mulf %126, %112 : vector<2x32xf32>
    %130 = arith.mulf %125, %127 : vector<2x32xf32>
    %131 = arith.addf %129, %130 : vector<2x32xf32>
    %132 = math.tanh %131 : vector<2x32xf32>
    %133 = arith.mulf %128, %132 : vector<2x32xf32>
    %134 = vector.extract_strided_slice %16 {offsets = [12, 0], sizes = [2, 128], strides = [1, 1]} : vector<28x128xf32> to vector<2x128xf32>
    %135 = arith.truncf %133 : vector<2x32xf32> to vector<2x32xbf16>
    %cst_27 = arith.constant dense<0.000000e+00> : vector<2x128xf32>
    %136 = tpu.matmul %135, %17, %cst_27 {dimension_numbers = #tpu.dot_dimension_numbers<[1], [0], [0], [1], [0, 0, 1, 1], [], []>} : vector<2x32xbf16>, vector<32x128xbf16>, vector<2x128xf32> -> vector<2x128xf32>
    %137 = arith.addf %134, %136 : vector<2x128xf32>
    %138 = arith.negf %137 : vector<2x128xf32>
    %139 = math.exp %138 : vector<2x128xf32>
    %cst_28 = arith.constant 1.000000e+00 : f32
    %140 = vector.broadcast %cst_28 : f32 to vector<2x128xf32>
    %141 = arith.addf %140, %139 : vector<2x128xf32>
    %142 = arith.divf %140, %141 : vector<2x128xf32>
    %143 = math.tanh %137 : vector<2x128xf32>
    %144 = vector.extract_strided_slice %142 {offsets = [0, 0], sizes = [2, 32], strides = [1, 1]} : vector<2x128xf32> to vector<2x32xf32>
    %145 = vector.extract_strided_slice %142 {offsets = [0, 32], sizes = [2, 32], strides = [1, 1]} : vector<2x128xf32> to vector<2x32xf32>
    %146 = vector.extract_strided_slice %143 {offsets = [0, 64], sizes = [2, 32], strides = [1, 1]} : vector<2x128xf32> to vector<2x32xf32>
    %147 = vector.extract_strided_slice %142 {offsets = [0, 96], sizes = [2, 32], strides = [1, 1]} : vector<2x128xf32> to vector<2x32xf32>
    %148 = arith.mulf %145, %131 : vector<2x32xf32>
    %149 = arith.mulf %144, %146 : vector<2x32xf32>
    %150 = arith.addf %148, %149 : vector<2x32xf32>
    %151 = math.tanh %150 : vector<2x32xf32>
    %152 = arith.mulf %147, %151 : vector<2x32xf32>
    %153 = vector.extract_strided_slice %16 {offsets = [14, 0], sizes = [2, 128], strides = [1, 1]} : vector<28x128xf32> to vector<2x128xf32>
    %154 = arith.truncf %152 : vector<2x32xf32> to vector<2x32xbf16>
    %cst_29 = arith.constant dense<0.000000e+00> : vector<2x128xf32>
    %155 = tpu.matmul %154, %17, %cst_29 {dimension_numbers = #tpu.dot_dimension_numbers<[1], [0], [0], [1], [0, 0, 1, 1], [], []>} : vector<2x32xbf16>, vector<32x128xbf16>, vector<2x128xf32> -> vector<2x128xf32>
    %156 = arith.addf %153, %155 : vector<2x128xf32>
    %157 = arith.negf %156 : vector<2x128xf32>
    %158 = math.exp %157 : vector<2x128xf32>
    %cst_30 = arith.constant 1.000000e+00 : f32
    %159 = vector.broadcast %cst_30 : f32 to vector<2x128xf32>
    %160 = arith.addf %159, %158 : vector<2x128xf32>
    %161 = arith.divf %159, %160 : vector<2x128xf32>
    %162 = math.tanh %156 : vector<2x128xf32>
    %163 = vector.extract_strided_slice %161 {offsets = [0, 0], sizes = [2, 32], strides = [1, 1]} : vector<2x128xf32> to vector<2x32xf32>
    %164 = vector.extract_strided_slice %161 {offsets = [0, 32], sizes = [2, 32], strides = [1, 1]} : vector<2x128xf32> to vector<2x32xf32>
    %165 = vector.extract_strided_slice %162 {offsets = [0, 64], sizes = [2, 32], strides = [1, 1]} : vector<2x128xf32> to vector<2x32xf32>
    %166 = vector.extract_strided_slice %161 {offsets = [0, 96], sizes = [2, 32], strides = [1, 1]} : vector<2x128xf32> to vector<2x32xf32>
    %167 = arith.mulf %164, %150 : vector<2x32xf32>
    %168 = arith.mulf %163, %165 : vector<2x32xf32>
    %169 = arith.addf %167, %168 : vector<2x32xf32>
    %170 = math.tanh %169 : vector<2x32xf32>
    %171 = arith.mulf %166, %170 : vector<2x32xf32>
    %172 = vector.extract_strided_slice %16 {offsets = [16, 0], sizes = [2, 128], strides = [1, 1]} : vector<28x128xf32> to vector<2x128xf32>
    %173 = arith.truncf %171 : vector<2x32xf32> to vector<2x32xbf16>
    %cst_31 = arith.constant dense<0.000000e+00> : vector<2x128xf32>
    %174 = tpu.matmul %173, %17, %cst_31 {dimension_numbers = #tpu.dot_dimension_numbers<[1], [0], [0], [1], [0, 0, 1, 1], [], []>} : vector<2x32xbf16>, vector<32x128xbf16>, vector<2x128xf32> -> vector<2x128xf32>
    %175 = arith.addf %172, %174 : vector<2x128xf32>
    %176 = arith.negf %175 : vector<2x128xf32>
    %177 = math.exp %176 : vector<2x128xf32>
    %cst_32 = arith.constant 1.000000e+00 : f32
    %178 = vector.broadcast %cst_32 : f32 to vector<2x128xf32>
    %179 = arith.addf %178, %177 : vector<2x128xf32>
    %180 = arith.divf %178, %179 : vector<2x128xf32>
    %181 = math.tanh %175 : vector<2x128xf32>
    %182 = vector.extract_strided_slice %180 {offsets = [0, 0], sizes = [2, 32], strides = [1, 1]} : vector<2x128xf32> to vector<2x32xf32>
    %183 = vector.extract_strided_slice %180 {offsets = [0, 32], sizes = [2, 32], strides = [1, 1]} : vector<2x128xf32> to vector<2x32xf32>
    %184 = vector.extract_strided_slice %181 {offsets = [0, 64], sizes = [2, 32], strides = [1, 1]} : vector<2x128xf32> to vector<2x32xf32>
    %185 = vector.extract_strided_slice %180 {offsets = [0, 96], sizes = [2, 32], strides = [1, 1]} : vector<2x128xf32> to vector<2x32xf32>
    %186 = arith.mulf %183, %169 : vector<2x32xf32>
    %187 = arith.mulf %182, %184 : vector<2x32xf32>
    %188 = arith.addf %186, %187 : vector<2x32xf32>
    %189 = math.tanh %188 : vector<2x32xf32>
    %190 = arith.mulf %185, %189 : vector<2x32xf32>
    %191 = vector.extract_strided_slice %16 {offsets = [18, 0], sizes = [2, 128], strides = [1, 1]} : vector<28x128xf32> to vector<2x128xf32>
    %192 = arith.truncf %190 : vector<2x32xf32> to vector<2x32xbf16>
    %cst_33 = arith.constant dense<0.000000e+00> : vector<2x128xf32>
    %193 = tpu.matmul %192, %17, %cst_33 {dimension_numbers = #tpu.dot_dimension_numbers<[1], [0], [0], [1], [0, 0, 1, 1], [], []>} : vector<2x32xbf16>, vector<32x128xbf16>, vector<2x128xf32> -> vector<2x128xf32>
    %194 = arith.addf %191, %193 : vector<2x128xf32>
    %195 = arith.negf %194 : vector<2x128xf32>
    %196 = math.exp %195 : vector<2x128xf32>
    %cst_34 = arith.constant 1.000000e+00 : f32
    %197 = vector.broadcast %cst_34 : f32 to vector<2x128xf32>
    %198 = arith.addf %197, %196 : vector<2x128xf32>
    %199 = arith.divf %197, %198 : vector<2x128xf32>
    %200 = math.tanh %194 : vector<2x128xf32>
    %201 = vector.extract_strided_slice %199 {offsets = [0, 0], sizes = [2, 32], strides = [1, 1]} : vector<2x128xf32> to vector<2x32xf32>
    %202 = vector.extract_strided_slice %199 {offsets = [0, 32], sizes = [2, 32], strides = [1, 1]} : vector<2x128xf32> to vector<2x32xf32>
    %203 = vector.extract_strided_slice %200 {offsets = [0, 64], sizes = [2, 32], strides = [1, 1]} : vector<2x128xf32> to vector<2x32xf32>
    %204 = vector.extract_strided_slice %199 {offsets = [0, 96], sizes = [2, 32], strides = [1, 1]} : vector<2x128xf32> to vector<2x32xf32>
    %205 = arith.mulf %202, %188 : vector<2x32xf32>
    %206 = arith.mulf %201, %203 : vector<2x32xf32>
    %207 = arith.addf %205, %206 : vector<2x32xf32>
    %208 = math.tanh %207 : vector<2x32xf32>
    %209 = arith.mulf %204, %208 : vector<2x32xf32>
    %210 = vector.extract_strided_slice %16 {offsets = [20, 0], sizes = [2, 128], strides = [1, 1]} : vector<28x128xf32> to vector<2x128xf32>
    %211 = arith.truncf %209 : vector<2x32xf32> to vector<2x32xbf16>
    %cst_35 = arith.constant dense<0.000000e+00> : vector<2x128xf32>
    %212 = tpu.matmul %211, %17, %cst_35 {dimension_numbers = #tpu.dot_dimension_numbers<[1], [0], [0], [1], [0, 0, 1, 1], [], []>} : vector<2x32xbf16>, vector<32x128xbf16>, vector<2x128xf32> -> vector<2x128xf32>
    %213 = arith.addf %210, %212 : vector<2x128xf32>
    %214 = arith.negf %213 : vector<2x128xf32>
    %215 = math.exp %214 : vector<2x128xf32>
    %cst_36 = arith.constant 1.000000e+00 : f32
    %216 = vector.broadcast %cst_36 : f32 to vector<2x128xf32>
    %217 = arith.addf %216, %215 : vector<2x128xf32>
    %218 = arith.divf %216, %217 : vector<2x128xf32>
    %219 = math.tanh %213 : vector<2x128xf32>
    %220 = vector.extract_strided_slice %218 {offsets = [0, 0], sizes = [2, 32], strides = [1, 1]} : vector<2x128xf32> to vector<2x32xf32>
    %221 = vector.extract_strided_slice %218 {offsets = [0, 32], sizes = [2, 32], strides = [1, 1]} : vector<2x128xf32> to vector<2x32xf32>
    %222 = vector.extract_strided_slice %219 {offsets = [0, 64], sizes = [2, 32], strides = [1, 1]} : vector<2x128xf32> to vector<2x32xf32>
    %223 = vector.extract_strided_slice %218 {offsets = [0, 96], sizes = [2, 32], strides = [1, 1]} : vector<2x128xf32> to vector<2x32xf32>
    %224 = arith.mulf %221, %207 : vector<2x32xf32>
    %225 = arith.mulf %220, %222 : vector<2x32xf32>
    %226 = arith.addf %224, %225 : vector<2x32xf32>
    %227 = math.tanh %226 : vector<2x32xf32>
    %228 = arith.mulf %223, %227 : vector<2x32xf32>
    %229 = vector.extract_strided_slice %16 {offsets = [22, 0], sizes = [2, 128], strides = [1, 1]} : vector<28x128xf32> to vector<2x128xf32>
    %230 = arith.truncf %228 : vector<2x32xf32> to vector<2x32xbf16>
    %cst_37 = arith.constant dense<0.000000e+00> : vector<2x128xf32>
    %231 = tpu.matmul %230, %17, %cst_37 {dimension_numbers = #tpu.dot_dimension_numbers<[1], [0], [0], [1], [0, 0, 1, 1], [], []>} : vector<2x32xbf16>, vector<32x128xbf16>, vector<2x128xf32> -> vector<2x128xf32>
    %232 = arith.addf %229, %231 : vector<2x128xf32>
    %233 = arith.negf %232 : vector<2x128xf32>
    %234 = math.exp %233 : vector<2x128xf32>
    %cst_38 = arith.constant 1.000000e+00 : f32
    %235 = vector.broadcast %cst_38 : f32 to vector<2x128xf32>
    %236 = arith.addf %235, %234 : vector<2x128xf32>
    %237 = arith.divf %235, %236 : vector<2x128xf32>
    %238 = math.tanh %232 : vector<2x128xf32>
    %239 = vector.extract_strided_slice %237 {offsets = [0, 0], sizes = [2, 32], strides = [1, 1]} : vector<2x128xf32> to vector<2x32xf32>
    %240 = vector.extract_strided_slice %237 {offsets = [0, 32], sizes = [2, 32], strides = [1, 1]} : vector<2x128xf32> to vector<2x32xf32>
    %241 = vector.extract_strided_slice %238 {offsets = [0, 64], sizes = [2, 32], strides = [1, 1]} : vector<2x128xf32> to vector<2x32xf32>
    %242 = vector.extract_strided_slice %237 {offsets = [0, 96], sizes = [2, 32], strides = [1, 1]} : vector<2x128xf32> to vector<2x32xf32>
    %243 = arith.mulf %240, %226 : vector<2x32xf32>
    %244 = arith.mulf %239, %241 : vector<2x32xf32>
    %245 = arith.addf %243, %244 : vector<2x32xf32>
    %246 = math.tanh %245 : vector<2x32xf32>
    %247 = arith.mulf %242, %246 : vector<2x32xf32>
    %248 = vector.extract_strided_slice %16 {offsets = [24, 0], sizes = [2, 128], strides = [1, 1]} : vector<28x128xf32> to vector<2x128xf32>
    %249 = arith.truncf %247 : vector<2x32xf32> to vector<2x32xbf16>
    %cst_39 = arith.constant dense<0.000000e+00> : vector<2x128xf32>
    %250 = tpu.matmul %249, %17, %cst_39 {dimension_numbers = #tpu.dot_dimension_numbers<[1], [0], [0], [1], [0, 0, 1, 1], [], []>} : vector<2x32xbf16>, vector<32x128xbf16>, vector<2x128xf32> -> vector<2x128xf32>
    %251 = arith.addf %248, %250 : vector<2x128xf32>
    %252 = arith.negf %251 : vector<2x128xf32>
    %253 = math.exp %252 : vector<2x128xf32>
    %cst_40 = arith.constant 1.000000e+00 : f32
    %254 = vector.broadcast %cst_40 : f32 to vector<2x128xf32>
    %255 = arith.addf %254, %253 : vector<2x128xf32>
    %256 = arith.divf %254, %255 : vector<2x128xf32>
    %257 = math.tanh %251 : vector<2x128xf32>
    %258 = vector.extract_strided_slice %256 {offsets = [0, 0], sizes = [2, 32], strides = [1, 1]} : vector<2x128xf32> to vector<2x32xf32>
    %259 = vector.extract_strided_slice %256 {offsets = [0, 32], sizes = [2, 32], strides = [1, 1]} : vector<2x128xf32> to vector<2x32xf32>
    %260 = vector.extract_strided_slice %257 {offsets = [0, 64], sizes = [2, 32], strides = [1, 1]} : vector<2x128xf32> to vector<2x32xf32>
    %261 = vector.extract_strided_slice %256 {offsets = [0, 96], sizes = [2, 32], strides = [1, 1]} : vector<2x128xf32> to vector<2x32xf32>
    %262 = arith.mulf %259, %245 : vector<2x32xf32>
    %263 = arith.mulf %258, %260 : vector<2x32xf32>
    %264 = arith.addf %262, %263 : vector<2x32xf32>
    %265 = math.tanh %264 : vector<2x32xf32>
    %266 = arith.mulf %261, %265 : vector<2x32xf32>
    %267 = vector.extract_strided_slice %16 {offsets = [26, 0], sizes = [2, 128], strides = [1, 1]} : vector<28x128xf32> to vector<2x128xf32>
    %268 = arith.truncf %266 : vector<2x32xf32> to vector<2x32xbf16>
    %cst_41 = arith.constant dense<0.000000e+00> : vector<2x128xf32>
    %269 = tpu.matmul %268, %17, %cst_41 {dimension_numbers = #tpu.dot_dimension_numbers<[1], [0], [0], [1], [0, 0, 1, 1], [], []>} : vector<2x32xbf16>, vector<32x128xbf16>, vector<2x128xf32> -> vector<2x128xf32>
    %270 = arith.addf %267, %269 : vector<2x128xf32>
    %271 = arith.negf %270 : vector<2x128xf32>
    %272 = math.exp %271 : vector<2x128xf32>
    %cst_42 = arith.constant 1.000000e+00 : f32
    %273 = vector.broadcast %cst_42 : f32 to vector<2x128xf32>
    %274 = arith.addf %273, %272 : vector<2x128xf32>
    %275 = arith.divf %273, %274 : vector<2x128xf32>
    %276 = math.tanh %270 : vector<2x128xf32>
    %277 = vector.extract_strided_slice %275 {offsets = [0, 0], sizes = [2, 32], strides = [1, 1]} : vector<2x128xf32> to vector<2x32xf32>
    %278 = vector.extract_strided_slice %275 {offsets = [0, 32], sizes = [2, 32], strides = [1, 1]} : vector<2x128xf32> to vector<2x32xf32>
    %279 = vector.extract_strided_slice %276 {offsets = [0, 64], sizes = [2, 32], strides = [1, 1]} : vector<2x128xf32> to vector<2x32xf32>
    %280 = vector.extract_strided_slice %275 {offsets = [0, 96], sizes = [2, 32], strides = [1, 1]} : vector<2x128xf32> to vector<2x32xf32>
    %281 = arith.mulf %278, %264 : vector<2x32xf32>
    %282 = arith.mulf %277, %279 : vector<2x32xf32>
    %283 = arith.addf %281, %282 : vector<2x32xf32>
    %284 = math.tanh %283 : vector<2x32xf32>
    %285 = arith.mulf %280, %284 : vector<2x32xf32>
    %c0_43 = arith.constant 0 : index
    %c0_44 = arith.constant 0 : index
    %286 = vector.load %arg6[%c0_43, %c0_44] : memref<32x2xf32, #tpu.memory_space<vmem>>, vector<32x2xf32>
    %cst_45 = arith.constant dense<0.000000e+00> : vector<2x2xf32>
    %287 = tpu.matmul %285, %286, %cst_45 {dimension_numbers = #tpu.dot_dimension_numbers<[1], [0], [0], [1], [0, 0, 1, 1], [], []>} : vector<2x32xf32>, vector<32x2xf32>, vector<2x2xf32> -> vector<2x2xf32>
    %c0_46 = arith.constant 0 : index
    %c0_47 = arith.constant 0 : index
    %288 = vector.load %arg7[%c0_46, %c0_47] : memref<1x2xf32, #tpu.memory_space<vmem>>, vector<1x2xf32>
    %289 = vector.broadcast %288 : vector<1x2xf32> to vector<2x2xf32>
    %290 = arith.addf %287, %289 : vector<2x2xf32>
    %c0_48 = arith.constant 0 : index
    %c0_49 = arith.constant 0 : index
    %291 = vector.load %arg8[%c0_48, %c0_49] : memref<2x2xf32, #tpu.memory_space<vmem>>, vector<2x2xf32>
    tpu.vector_store %arg8[%c0_48, %c0_49], %290 {strides = array<i32>} : memref<2x2xf32, #tpu.memory_space<vmem>>, vector<2x2xf32>,
    return
  }
}

</mosaic_0001>

<bundles_post_ra>
// kernel: clstm_forward.1
= control target key start
LH: loop header
LB: loop body
LE: loop exit
PB: predicated region body
PF: predicated region fallthrough
CT: control target
= control target key end

     0   :  { %vm100_vm0 = vcmask 785408   ;;  %s2186_s0 = inlined_call_operand.vmem [shape: bf16[28,96], index: 0, kind: input, shape index: {}]   ;;  %s2187_s1 = inlined_call_operand.vmem [shape: bf16[96,16], index: 1, kind: input, shape index: {}]   ;;  %s2188_s2 = inlined_call_operand.vmem [shape: f32[1,16], index: 2, kind: input, shape index: {}]   ;;  %s2189_s3 = inlined_call_operand.vmem [shape: bf16[16,128], index: 3, kind: input, shape index: {}]   ;;  %s2190_s4 = inlined_call_operand.vmem [shape: bf16[32,128], index: 4, kind: input, shape index: {}]   ;;  %s2191_s5 = inlined_call_operand.vmem [shape: f32[1,128], index: 5, kind: input, shape index: {}]   ;;  %s2192_s6 = inlined_call_operand.vmem [shape: f32[32,2], index: 6, kind: input, shape index: {}]   ;;  %s2193_s7 = inlined_call_operand.vmem [shape: f32[1,2], index: 7, kind: input, shape index: {}]   ;;  %s2194_s8 = inlined_call_operand.hbm [shape: f32[2,2], index: 8, kind: output, shape index: {}]  }
   0x1   :  { %v1721_v0 = vld [vmem:[%s2187_s1] sm:$0xff]   ;;  %v1722_v1 = vld [vmem:[%s2187_s1 + $0x8] sm:$0xff]   ;;  %v1723_v2 = vld [vmem:[%s2187_s1 + $0x10] sm:$0xff]  }
   0x2   :  { %1563 = vmatprep.subr.bf16.mxu0 %v1721_v0  ;;  %v1727_v3 = vld [vmem:[%s2186_s0] sm:$0xff]   ;;  %v1724_v4 = vld [vmem:[%s2187_s1 + $0x18] sm:$0xff]  }
   0x3   :  { %1564 = vmatpush3.bf16.msra.mxu0 %v1721_v0  ;;  %1575 = vmatprep.mubr.msk.bf16.mxu0 %vm100_vm0, %v1727_v3 }
   0x4   :  { %1565 = vmatprep.subr.bf16.mxu0 %v1722_v1 }
   0x7   :  { %1566 = vmatpush3.bf16.msra.mxu0 %v1722_v1 }
   0x8   :  { %1567 = vmatprep.subr.bf16.mxu0 %v1723_v2 }
   0x9   :  { %13 = vsyncpa [#allocation3], 0  ;;  %v1725_v5 = vld [vmem:[%s2187_s1 + $0x20] sm:$0xff]   ;;  %v1726_v6 = vld [vmem:[%s2187_s1 + $0x28] sm:$0xff]   ;;  %v1884_v10 = vmov 0.0   ;;  %vm1885_vm1 = vmmov 0  }
   0xa   :  { %v1728_v7 = vld [vmem:[%s2186_s0 + $0x8] sm:$0x3f]   ;;  %v1729_v8 = vld [vmem:[%s2189_s3] sm:$0xff]   ;;  %vm197_vm2 = vcmask 130048   ;;  %v1886_v39 = vmov 0   ;;  %s1888_s26 = smov 32  }
   0xb   :  { %1568 = vmatpush3.bf16.msra.mxu0 %v1723_v2  ;;  %1579 = vmatprep.subr.bf16.mxu1 %v1729_v8  ;;  %v1968_v9 = vld [vmem:[%s2190_s4] sm:$0xff]   ;;  %v1977_v11 = vld [vmem:[%s2190_s4 + $0x8] sm:$0xff]   ;;  %vm269_vm3 = vcmask 261120   ;;  %vm1439_vm4 = vcmask 9216  }
   0xc   :  { %1569 = vmatprep.subr.bf16.mxu0 %v1724_v4  ;;  %1580 = vmatpush3.bf16.msra.mxu1 %v1729_v8  ;;  %v1455_v12 = vld [vmem:[%s2188_s2] ss:$0 sm:$0xff] }
   0xd   :  { %1585 = vmatprep.subr.bf16.mxu1 %v1884_v10  ;;  %v1470_v40 = vld [vmem:[%s2191_s5] ss:$0 sm:$0xff]  ;;  %s1887_s5 = smov 64  }
   0xf   :  { %1570 = vmatpush3.bf16.msra.mxu0 %v1724_v4 }
  0x10   :  { %1571 = vmatprep.subr.bf16.mxu0 %v1725_v5 }
  0x13   :  { %1572 = vmatpush3.bf16.msra.mxu0 %v1725_v5 }
  0x14   :  { %1573 = vmatprep.subr.bf16.mxu0 %v1726_v6 }
  0x17   :  { %1574 = vmatpush3.bf16.msra.mxu0 %v1726_v6 }
  0x18   :  { %1609 = vmatprep.subr.bf16.mxu0 %v1884_v10 }
  0x1a   :  { %1576 = vmatmul.mubr.msk.bf16.vlgmr.msra.gmra.mrb[0].mxu0 %vm100_vm0, %v1728_v7 }
  0x1b   :  { %1610 = vmatpush3.bf16.msra.mxu0 %v1968_v9  ;;  %1613 = vmatprep.mubr.msk.bf16.mxu0 %vm1885_vm1, %v1884_v10 }
  0x1c   :  { %1611 = vmatprep.subr.bf16.mxu0 %v1884_v10 }
  0x1f   :  { %1612 = vmatpush3.bf16.msra.mxu0 %v1977_v11 }
  0x20   :  { %1625 = vmatprep.subr.bf16.mxu0 %v1884_v10 }
  0xed   :  { %v1577_v13 = vpop.f32.mrb[0].mxu0 }
  0xee   :  { %v150_v14 = vadd.f32 %v1577_v13, %v1455_v12  ;;  %v141_v15 = vpop.f32.mrb[1].mxu0 }
  0xef   :  { %v142_v16 = vadd.f32 %v1455_v12, %v141_v15  ;;  %v1578_v17 = vpop.f32.mrb[2].mxu0 }
  0xf0   :  { %v1468_v18 = vmul.f32 -1.442695, %v150_v14  ;;  %v153_v19 = vadd.f32 %v1578_v17, %v1455_v12  ;;  %v144_v20 = vpop.f32.mrb[3].mxu0 }
  0xf1   :  { %v1466_v21 = vmul.f32 -1.442695, %v142_v16  ;;  %v145_v22 = vadd.f32 %v1455_v12, %v144_v20 }
  0xf2   :  { %1732 = vpow2.f32 %v1468_v18  ;;  %v1469_v23 = vmul.f32 -1.442695, %v153_v19 }
  0xf3   :  { %1734 = vpow2.f32 %v1466_v21  ;;  %v1467_v24 = vmul.f32 -1.442695, %v145_v22 }
  0xf4   :  { %1736 = vpow2.f32 %v1469_v23 }
  0xf5   :  { %1738 = vpow2.f32 %v1467_v24 }
  0xfc   :  { %v1733_v25 = vpop.eup %1732 }
  0xfd   :  { %v1735_v26 = vpop.eup %1734  ;;  %v170_v27 = vadd.f32 1.0, %v1733_v25 }
  0xfe   :  { %v1737_v28 = vpop.eup %1736  ;;  %v168_v29 = vadd.f32 1.0, %v1735_v26 }
  0xff   :  { %v1739_v30 = vpop.eup %1738  ;;  %1740 = vrcp.f32 %v170_v27  ;;  %v171_v31 = vadd.f32 1.0, %v1737_v28 }
 0x100   :  { %1742 = vrcp.f32 %v168_v29  ;;  %v169_v32 = vadd.f32 1.0, %v1739_v30 }
 0x101   :  { %1744 = vrcp.f32 %v171_v31 }
 0x102   :  { %1746 = vrcp.f32 %v169_v32 }
 0x109   :  { %v1741_v33 = vpop.eup %1740 }
 0x10a   :  { %v1743_v34 = vpop.eup %1742 }
 0x10b   :  { %v1745_v35 = vpop.eup %1744 }
 0x10c   :  { %v1747_v36 = vpop.eup %1746  ;;  %v181_v37 = vpack.c.bf16 %v1745_v35, %v1741_v33 }
 0x10d   :  { %v180_v38 = vpack.c.bf16 %v1747_v36, %v1743_v34 }
 0x10f   :  { %1581 = vmatprep.mubr.msk.bf16.mxu1 %vm197_vm2, %v180_v38 }
 0x110   :  { %1582 = vmatmul.mubr.msk.bf16.vlgmr.msra.gmra.mrb[0].mxu1 %vm197_vm2, %v181_v37 }
 0x111   :  { %1586 = vmatpush3.bf16.msra.mxu1 %v1968_v9  ;;  %1589 = vmatprep.mubr.msk.bf16.mxu1 %vm1885_vm1, %v1884_v10 }
 0x112   :  { %1587 = vmatprep.subr.bf16.mxu1 %v1884_v10 }
 0x115   :  { %1588 = vmatpush3.bf16.msra.mxu1 %v1977_v11 }
 0x116   :  { %1593 = vmatprep.subr.bf16.mxu1 %v1884_v10 }
 0x118   :  { %1590 = vmatmul.mubr.bf16.vlgmr.msra.gmra.mrb[4].mxu1 %v1886_v39 }
 0x119   :  { %1594 = vmatpush3.bf16.msra.mxu1 %v1968_v9  ;;  %1597 = vmatprep.mubr.msk.bf16.mxu1 %vm1885_vm1, %v1884_v10 }
 0x11a   :  { %1595 = vmatprep.subr.bf16.mxu1 %v1884_v10 }
 0x11d   :  { %1596 = vmatpush3.bf16.msra.mxu1 %v1977_v11 }
 0x11e   :  { %1601 = vmatprep.subr.bf16.mxu1 %v1884_v10 }
 0x1e3   :  { %v1583_v41 = vpop.f32.mrb[0].mxu1 }
 0x1e4   :  { %v2001_v42 = vadd.f32 %v1583_v41, %v1470_v40  ;;  %v238_v43 = vpop.f32.mrb[1].mxu1 }
 0x1e5   :  { %v1584_v44 = vpop.f32.mrb[2].mxu1  ;;  %v2007_v48 = vadd.f32 %v1470_v40, %v238_v43 }
 0x1e6   :  { %v2003_v45 = vadd.f32 %v1584_v44, %v1470_v40  ;;  %v241_v46 = vpop.f32.mrb[3].mxu1 }
 0x1e7   :  { %v2005_v47 = vadd.f32 %v1470_v40, %v241_v46 }
 0x1eb   :  { %v307_v49 = vpop.f32.mrb[4].mxu1 }
 0x1ec   :  { %v313_v50 = vadd.f32 %v307_v49, %v2007_v48  ;;  %v1591_v51 = vpop.f32.mrb[5].mxu1 }
 0x1ed   :  { %v310_v52 = vpop.f32.mrb[6].mxu1 }
 0x1ee   :  { %1748 = vtanh.f32 %v313_v50  ;;  %v1592_v53 = vpop.f32.mrb[7].mxu1  ;;  %v1476_v55 = vmul.f32 -1.442695, %v313_v50 }
 0x1f0   :  { %1750 = vpow2.f32 %v1476_v55 }
 0x1f8   :  { %v1749_v54 = vpop.eup %1748 }
 0x1f9   :  { %323 = vrot.lane.b32.xlu0 %v1749_v54, %s1887_s5 }
 0x1fa   :  { %v1751_v56 = vpop.eup %1750 }
 0x1fb   :  { %v317_v57 = vadd.f32 1.0, %v1751_v56 }
 0x1fd   :  { %1752 = vrcp.f32 %v317_v57 }
 0x207   :  { %v1753_v58 = vpop.eup %1752 }
 0x208   :  { %v321_v61 = vmul.f32 0.0, %v1753_v58 }
 0x26b   :  { %v324_v59 = vpop.permute.xlu0 %323 }
 0x26c   :  { %v326_v60 = vmul.f32 %v1753_v58, %v324_v59 }
 0x26e   :  { %328 = vrot.lane.b32.xlu0 %v326_v60, %s1888_s26 }
 0x2e0   :  { %v329_v62 = vpop.permute.xlu0 %328 }
 0x2e1   :  { %v331_v63 = vadd.f32 %v329_v62, %v321_v61 }
 0x2e3   :  { %1754 = vtanh.f32 %v331_v63  ;;  %v397_v21 = vrot.slane %v331_v63, 6 }
 0x2ed   :  { %v1755_v0 = vpop.eup %1754 }
 0x2ee   :  { %334 = vrot.lane.b32.xlu1 %v1755_v0, %s1887_s5 }
 0x360   :  { %v335_v1 = vpop.permute.xlu1 %334 }
 0x361   :  { %v337_v2 = vmul.f32 %v1753_v58, %v335_v1 }
 0x363   :  { %v338_v3 = vpack.c.bf16 %v337_v2, %v337_v2 }
 0x365   :  { %340 = vrot.lane.b32.xlu1 %v338_v3, %s1888_s26 }
 0x3d7   :  { %v341_v4 = vpop.permute.xlu1 %340 }
 0x3d8   :  { %1598 = vmatmul.mubr.msk.bf16.vlgmr.msra.gmra.mrb[8].mxu1 %vm269_vm3, %v341_v4 }
 0x3d9   :  { %1602 = vmatpush3.bf16.msra.mxu1 %v1968_v9  ;;  %1605 = vmatprep.mubr.msk.bf16.mxu1 %vm1885_vm1, %v1884_v10 }
 0x3da   :  { %1603 = vmatprep.subr.bf16.mxu1 %v1884_v10 }
 0x3dd   :  { %1604 = vmatpush3.bf16.msra.mxu1 %v1977_v11 }
 0x3de   :  { %1617 = vmatprep.subr.bf16.mxu1 %v1884_v10 }
 0x4ab   :  { %v379_v5 = vpop.f32.mrb[8].mxu1 }
 0x4ac   :  { %v386_v6 = vrot.slane %v379_v5, 6  ;;  %v1599_v7 = vpop.f32.mrb[9].mxu1 }
 0x4ad   :  { %v382_v8 = vpop.f32.mrb[10].mxu1 }
 0x4ae   :  { %v388_v12 = vadd.f32 %v386_v6, %v2007_v48  ;;  %v1600_v13 = vpop.f32.mrb[11].mxu1 }
 0x4b0   :  { %1756 = vtanh.f32 %v388_v12  ;;  %v1478_v15 = vmul.f32 -1.442695, %v388_v12 }
 0x4b2   :  { %1758 = vpow2.f32 %v1478_v15 }
 0x4ba   :  { %v1757_v14 = vpop.eup %1756 }
 0x4bb   :  { %401 = vrot.lane.b32.xlu0 %v1757_v14, %s1887_s5 }
 0x4bc   :  { %v1759_v16 = vpop.eup %1758 }
 0x4bd   :  { %v392_v17 = vadd.f32 1.0, %v1759_v16 }
 0x4bf   :  { %1760 = vrcp.f32 %v392_v17 }
 0x4c9   :  { %v1761_v18 = vpop.eup %1760 }
 0x4ca   :  { %v399_v22 = vmul.f32 %v1761_v18, %v397_v21 }
 0x52d   :  { %v402_v19 = vpop.permute.xlu0 %401 }
 0x52e   :  { %v404_v20 = vmul.f32 %v1761_v18, %v402_v19 }
 0x530   :  { %406 = vrot.lane.b32.xlu1 %v404_v20, %s1888_s26 }
 0x5a2   :  { %v407_v23 = vpop.permute.xlu1 %406 }
 0x5a3   :  { %v409_v24 = vadd.f32 %v407_v23, %v399_v22 }
 0x5a5   :  { %1762 = vtanh.f32 %v409_v24  ;;  %v476_v46 = vrot.slane %v409_v24, 6 }
 0x5af   :  { %v1763_v25 = vpop.eup %1762 }
 0x5b0   :  { %412 = vrot.lane.b32.xlu0 %v1763_v25, %s1887_s5 }
 0x622   :  { %v413_v26 = vpop.permute.xlu0 %412 }
 0x623   :  { %v415_v27 = vmul.f32 %v1761_v18, %v413_v26 }
 0x625   :  { %v416_v28 = vpack.c.bf16 %v415_v27, %v415_v27 }
 0x627   :  { %v418_v29 = vrot.slane %v416_v28, 1 }
 0x629   :  { %419 = vrot.lane.b32.xlu1 %v418_v29, %s1888_s26 }
 0x69b   :  { %v420_v30 = vpop.permute.xlu1 %419 }
 0x69c   :  { %1606 = vmatmul.mubr.msk.bf16.vlgmr.msra.gmra.mrb[12].mxu1 %vm269_vm3, %v420_v30 }
 0x69d   :  { %1618 = vmatpush3.bf16.msra.mxu1 %v1968_v9  ;;  %1621 = vmatprep.mubr.msk.bf16.mxu1 %vm1885_vm1, %v1884_v10 }
 0x69e   :  { %1619 = vmatprep.subr.bf16.mxu1 %v1884_v10 }
 0x6a1   :  { %1620 = vmatpush3.bf16.msra.mxu1 %v1977_v11 }
 0x6a2   :  { %1633 = vmatprep.subr.bf16.mxu1 %v1884_v10 }
 0x76f   :  { %v458_v31 = vpop.f32.mrb[12].mxu1 }
 0x770   :  { %v465_v32 = vrot.slane %v458_v31, 4  ;;  %v1607_v33 = vpop.f32.mrb[13].mxu1 }
 0x771   :  { %v461_v34 = vpop.f32.mrb[14].mxu1 }
 0x772   :  { %v467_v35 = vadd.f32 %v465_v32, %v2007_v48  ;;  %v1608_v36 = vpop.f32.mrb[15].mxu1 }
 0x774   :  { %1764 = vtanh.f32 %v467_v35  ;;  %v1480_v38 = vmul.f32 -1.442695, %v467_v35 }
 0x776   :  { %1766 = vpow2.f32 %v1480_v38 }
 0x77e   :  { %v1765_v37 = vpop.eup %1764 }
 0x77f   :  { %480 = vrot.lane.b32.xlu0 %v1765_v37, %s1887_s5 }
 0x780   :  { %v1767_v39 = vpop.eup %1766 }
 0x781   :  { %v471_v40 = vadd.f32 1.0, %v1767_v39 }
 0x783   :  { %1768 = vrcp.f32 %v471_v40 }
 0x78d   :  { %v1769_v41 = vpop.eup %1768 }
 0x78e   :  { %v478_v49 = vmul.f32 %v1769_v41, %v476_v46 }
 0x7f1   :  { %v481_v43 = vpop.permute.xlu0 %480 }
 0x7f2   :  { %v483_v44 = vmul.f32 %v1769_v41, %v481_v43 }
 0x7f4   :  { %485 = vrot.lane.b32.xlu1 %v483_v44, %s1888_s26 }
 0x866   :  { %v486_v50 = vpop.permute.xlu1 %485 }
 0x867   :  { %v488_v51 = vadd.f32 %v486_v50, %v478_v49 }
 0x869   :  { %1770 = vtanh.f32 %v488_v51  ;;  %v555_v7 = vrot.slane %v488_v51, 6 }
 0x873   :  { %v1771_v52 = vpop.eup %1770 }
 0x874   :  { %491 = vrot.lane.b32.xlu0 %v1771_v52, %s1887_s5 }
 0x8e6   :  { %v492_v53 = vpop.permute.xlu0 %491 }
 0x8e7   :  { %v494_v54 = vmul.f32 %v1769_v41, %v492_v53 }
 0x8e9   :  { %v495_v55 = vpack.c.bf16 %v494_v54, %v494_v54 }
 0x8eb   :  { %v497_v56 = vrot.slane %v495_v55, 2 }
 0x8ed   :  { %498 = vrot.lane.b32.xlu1 %v497_v56, %s1888_s26 }
 0x95f   :  { %v499_v57 = vpop.permute.xlu1 %498 }
 0x960   :  { %1614 = vmatmul.mubr.msk.bf16.vlgmr.msra.gmra.mrb[4].mxu0 %vm269_vm3, %v499_v57 }
 0x961   :  { %1626 = vmatpush3.bf16.msra.mxu0 %v1968_v9  ;;  %1629 = vmatprep.mubr.msk.bf16.mxu0 %vm1885_vm1, %v1884_v10 }
 0x962   :  { %1627 = vmatprep.subr.bf16.mxu0 %v1884_v10 }
 0x965   :  { %1628 = vmatpush3.bf16.msra.mxu0 %v1977_v11 }
 0x966   :  { %1641 = vmatprep.subr.bf16.mxu0 %v1884_v10 }
 0xa33   :  { %v537_v58 = vpop.f32.mrb[4].mxu0 }
 0xa34   :  { %v544_v59 = vrot.slane %v537_v58, 2  ;;  %v1615_v60 = vpop.f32.mrb[5].mxu0 }
 0xa35   :  { %v540_v61 = vpop.f32.mrb[6].mxu0 }
 0xa36   :  { %v546_v62 = vadd.f32 %v544_v59, %v2007_v48  ;;  %v1616_v63 = vpop.f32.mrb[7].mxu0 }
 0xa38   :  { %1772 = vtanh.f32 %v546_v62  ;;  %v1482_v1 = vmul.f32 -1.442695, %v546_v62 }
 0xa3a   :  { %1774 = vpow2.f32 %v1482_v1 }
 0xa42   :  { %v1773_v0 = vpop.eup %1772 }
 0xa43   :  { %559 = vrot.lane.b32.xlu0 %v1773_v0, %s1887_s5 }
 0xa44   :  { %v1775_v2 = vpop.eup %1774 }
 0xa45   :  { %v550_v3 = vadd.f32 1.0, %v1775_v2 }
 0xa47   :  { %1776 = vrcp.f32 %v550_v3 }
 0xa51   :  { %v1777_v4 = vpop.eup %1776 }
 0xa52   :  { %v557_v8 = vmul.f32 %v1777_v4, %v555_v7 }
 0xab5   :  { %v560_v5 = vpop.permute.xlu0 %559 }
 0xab6   :  { %v562_v6 = vmul.f32 %v1777_v4, %v560_v5 }
 0xab8   :  { %564 = vrot.lane.b32.xlu1 %v562_v6, %s1888_s26 }
 0xb2a   :  { %v565_v12 = vpop.permute.xlu1 %564 }
 0xb2b   :  { %v567_v13 = vadd.f32 %v565_v12, %v557_v8 }
 0xb2d   :  { %1778 = vtanh.f32 %v567_v13  ;;  %v631_v31 = vrot.slane %v567_v13, 6 }
 0xb37   :  { %v1779_v48 = vpop.eup %1778 }
 0xb38   :  { %570 = vrot.lane.b32.xlu0 %v1779_v48, %s1887_s5 }
 0xbaa   :  { %v571_v14 = vpop.permute.xlu0 %570 }
 0xbab   :  { %v573_v15 = vmul.f32 %v1777_v4, %v571_v14 }
 0xbad   :  { %v574_v16 = vpack.c.bf16 %v573_v15, %v573_v15 }
 0xbaf   :  { %v576_v17 = vrot.slane %v574_v16, 3 }
 0xbb1   :  { %577 = vrot.lane.b32.xlu1 %v576_v17, %s1888_s26 }
 0xc23   :  { %v578_v18 = vpop.permute.xlu1 %577 }
 0xc24   :  { %1622 = vmatmul.mubr.msk.bf16.vlgmr.msra.gmra.mrb[16].mxu1 %vm269_vm3, %v578_v18 }
 0xc25   :  { %1634 = vmatpush3.bf16.msra.mxu1 %v1968_v9  ;;  %1637 = vmatprep.mubr.msk.bf16.mxu1 %vm1885_vm1, %v1884_v10 }
 0xc26   :  { %1635 = vmatprep.subr.bf16.mxu1 %v1884_v10 }
 0xc29   :  { %1636 = vmatpush3.bf16.msra.mxu1 %v1977_v11 }
 0xc2a   :  { %1649 = vmatprep.subr.bf16.mxu1 %v1884_v10 }
 0xcf7   :  { %v616_v19 = vpop.f32.mrb[16].mxu1 }
 0xcf8   :  { %v622_v20 = vadd.f32 %v616_v19, %v2005_v47  ;;  %v1623_v21 = vpop.f32.mrb[17].mxu1 }
 0xcf9   :  { %v619_v22 = vpop.f32.mrb[18].mxu1 }
 0xcfa   :  { %1780 = vtanh.f32 %v622_v20  ;;  %v1624_v23 = vpop.f32.mrb[19].mxu1  ;;  %v1484_v25 = vmul.f32 -1.442695, %v622_v20 }
 0xcfc   :  { %1782 = vpow2.f32 %v1484_v25 }
 0xd04   :  { %v1781_v24 = vpop.eup %1780 }
 0xd05   :  { %635 = vrot.lane.b32.xlu0 %v1781_v24, %s1887_s5 }
 0xd06   :  { %v1783_v26 = vpop.eup %1782 }
 0xd07   :  { %v626_v27 = vadd.f32 1.0, %v1783_v26 }
 0xd09   :  { %1784 = vrcp.f32 %v626_v27 }
 0xd13   :  { %v1785_v28 = vpop.eup %1784 }
 0xd14   :  { %v633_v32 = vmul.f32 %v1785_v28, %v631_v31 }
 0xd77   :  { %v636_v29 = vpop.permute.xlu0 %635 }
 0xd78   :  { %v638_v30 = vmul.f32 %v1785_v28, %v636_v29 }
 0xd7a   :  { %640 = vrot.lane.b32.xlu1 %v638_v30, %s1888_s26 }
 0xdec   :  { %v641_v33 = vpop.permute.xlu1 %640 }
 0xded   :  { %v643_v34 = vadd.f32 %v641_v33, %v633_v32 }
 0xdef   :  { %1786 = vtanh.f32 %v643_v34  ;;  %v709_v57 = vrot.slane %v643_v34, 6 }
 0xdf9   :  { %v1787_v35 = vpop.eup %1786 }
 0xdfa   :  { %646 = vrot.lane.b32.xlu0 %v1787_v35, %s1887_s5 }
 0xe6c   :  { %v647_v36 = vpop.permute.xlu0 %646 }
 0xe6d   :  { %v649_v37 = vmul.f32 %v1785_v28, %v647_v36 }
 0xe6f   :  { %v650_v38 = vpack.c.bf16 %v649_v37, %v649_v37 }
 0xe71   :  { %652 = vrot.lane.b32.xlu1 %v650_v38, %s1888_s26 }
 0xee3   :  { %v653_v39 = vpop.permute.xlu1 %652 }
 0xee4   :  { %1630 = vmatmul.mubr.msk.bf16.vlgmr.msra.gmra.mrb[8].mxu0 %vm269_vm3, %v653_v39 }
 0xee5   :  { %1642 = vmatpush3.bf16.msra.mxu0 %v1968_v9  ;;  %1645 = vmatprep.mubr.msk.bf16.mxu0 %vm1885_vm1, %v1884_v10 }
 0xee6   :  { %1643 = vmatprep.subr.bf16.mxu0 %v1884_v10 }
 0xee9   :  { %1644 = vmatpush3.bf16.msra.mxu0 %v1977_v11 }
 0xeea   :  { %1657 = vmatprep.subr.bf16.mxu0 %v1884_v10 }
 0xfb7   :  { %v691_v40 = vpop.f32.mrb[8].mxu0 }
 0xfb8   :  { %v698_v41 = vrot.slane %v691_v40, 6  ;;  %v1631_v43 = vpop.f32.mrb[9].mxu0 }
 0xfb9   :  { %v694_v44 = vpop.f32.mrb[10].mxu0 }
 0xfba   :  { %v700_v46 = vadd.f32 %v698_v41, %v2005_v47  ;;  %v1632_v49 = vpop.f32.mrb[11].mxu0 }
 0xfbc   :  { %1788 = vtanh.f32 %v700_v46  ;;  %v1486_v51 = vmul.f32 -1.442695, %v700_v46 }
 0xfbe   :  { %1790 = vpow2.f32 %v1486_v51 }
 0xfc6   :  { %v1789_v50 = vpop.eup %1788 }
 0xfc7   :  { %713 = vrot.lane.b32.xlu0 %v1789_v50, %s1887_s5 }
 0xfc8   :  { %v1791_v52 = vpop.eup %1790 }
 0xfc9   :  { %v704_v53 = vadd.f32 1.0, %v1791_v52 }
 0xfcb   :  { %1792 = vrcp.f32 %v704_v53 }
 0xfd5   :  { %v1793_v54 = vpop.eup %1792 }
 0xfd6   :  { %v711_v58 = vmul.f32 %v1793_v54, %v709_v57 }
0x1039   :  { %v714_v55 = vpop.permute.xlu0 %713 }
0x103a   :  { %v716_v56 = vmul.f32 %v1793_v54, %v714_v55 }
0x103c   :  { %718 = vrot.lane.b32.xlu1 %v716_v56, %s1888_s26 }
0x10ae   :  { %v719_v59 = vpop.permute.xlu1 %718 }
0x10af   :  { %v721_v60 = vadd.f32 %v719_v59, %v711_v58 }
0x10b1   :  { %1794 = vtanh.f32 %v721_v60  ;;  %v788_v18 = vrot.slane %v721_v60, 6 }
0x10bb   :  { %v1795_v61 = vpop.eup %1794 }
0x10bc   :  { %724 = vrot.lane.b32.xlu0 %v1795_v61, %s1887_s5 }
0x112e   :  { %v725_v62 = vpop.permute.xlu0 %724 }
0x112f   :  { %v727_v63 = vmul.f32 %v1793_v54, %v725_v62 }
0x1131   :  { %v728_v0 = vpack.c.bf16 %v727_v63, %v727_v63 }
0x1133   :  { %v730_v1 = vrot.slane %v728_v0, 1 }
0x1135   :  { %731 = vrot.lane.b32.xlu1 %v730_v1, %s1888_s26 }
0x11a7   :  { %v732_v2 = vpop.permute.xlu1 %731 }
0x11a8   :  { %1638 = vmatmul.mubr.msk.bf16.vlgmr.msra.gmra.mrb[20].mxu1 %vm269_vm3, %v732_v2 }
0x11a9   :  { %1650 = vmatpush3.bf16.msra.mxu1 %v1968_v9  ;;  %1653 = vmatprep.mubr.msk.bf16.mxu1 %vm1885_vm1, %v1884_v10 }
0x11aa   :  { %1651 = vmatprep.subr.bf16.mxu1 %v1884_v10 }
0x11ad   :  { %1652 = vmatpush3.bf16.msra.mxu1 %v1977_v11 }
0x11ae   :  { %1665 = vmatprep.subr.bf16.mxu1 %v1884_v10 }
0x127b   :  { %v770_v3 = vpop.f32.mrb[20].mxu1 }
0x127c   :  { %v777_v4 = vrot.slane %v770_v3, 4  ;;  %v1639_v5 = vpop.f32.mrb[21].mxu1 }
0x127d   :  { %v773_v6 = vpop.f32.mrb[22].mxu1 }
0x127e   :  { %v779_v7 = vadd.f32 %v777_v4, %v2005_v47  ;;  %v1640_v8 = vpop.f32.mrb[23].mxu1 }
0x1280   :  { %1796 = vtanh.f32 %v779_v7  ;;  %v1488_v13 = vmul.f32 -1.442695, %v779_v7 }
0x1282   :  { %1798 = vpow2.f32 %v1488_v13 }
0x128a   :  { %v1797_v12 = vpop.eup %1796 }
0x128b   :  { %792 = vrot.lane.b32.xlu0 %v1797_v12, %s1887_s5 }
0x128c   :  { %v1799_v48 = vpop.eup %1798 }
0x128d   :  { %v783_v14 = vadd.f32 1.0, %v1799_v48 }
0x128f   :  { %1800 = vrcp.f32 %v783_v14 }
0x1299   :  { %v1801_v15 = vpop.eup %1800 }
0x129a   :  { %v790_v19 = vmul.f32 %v1801_v15, %v788_v18 }
0x12fd   :  { %v793_v16 = vpop.permute.xlu0 %792 }
0x12fe   :  { %v795_v17 = vmul.f32 %v1801_v15, %v793_v16 }
0x1300   :  { %797 = vrot.lane.b32.xlu1 %v795_v17, %s1888_s26 }
0x1372   :  { %v798_v20 = vpop.permute.xlu1 %797 }
0x1373   :  { %v800_v21 = vadd.f32 %v798_v20, %v790_v19 }
0x1375   :  { %1802 = vtanh.f32 %v800_v21  ;;  %v867_v41 = vrot.slane %v800_v21, 6 }
0x137f   :  { %v1803_v22 = vpop.eup %1802 }
0x1380   :  { %803 = vrot.lane.b32.xlu0 %v1803_v22, %s1887_s5 }
0x13f2   :  { %v804_v23 = vpop.permute.xlu0 %803 }
0x13f3   :  { %v806_v24 = vmul.f32 %v1801_v15, %v804_v23 }
0x13f5   :  { %v807_v25 = vpack.c.bf16 %v806_v24, %v806_v24 }
0x13f7   :  { %v809_v26 = vrot.slane %v807_v25, 2 }
0x13f9   :  { %810 = vrot.lane.b32.xlu1 %v809_v26, %s1888_s26 }
0x146b   :  { %v811_v27 = vpop.permute.xlu1 %810 }
0x146c   :  { %1646 = vmatmul.mubr.msk.bf16.vlgmr.msra.gmra.mrb[12].mxu0 %vm269_vm3, %v811_v27 }
0x146d   :  { %1658 = vmatpush3.bf16.msra.mxu0 %v1968_v9  ;;  %1661 = vmatprep.mubr.msk.bf16.mxu0 %vm1885_vm1, %v1884_v10 }
0x146e   :  { %1659 = vmatprep.subr.bf16.mxu0 %v1884_v10 }
0x1471   :  { %1660 = vmatpush3.bf16.msra.mxu0 %v1977_v11 }
0x1472   :  { %1673 = vmatprep.subr.bf16.mxu0 %v1884_v10 }
0x153f   :  { %v849_v28 = vpop.f32.mrb[12].mxu0 }
0x1540   :  { %v856_v29 = vrot.slane %v849_v28, 2  ;;  %v1647_v30 = vpop.f32.mrb[13].mxu0 }
0x1541   :  { %v852_v31 = vpop.f32.mrb[14].mxu0 }
0x1542   :  { %v858_v32 = vadd.f32 %v856_v29, %v2005_v47  ;;  %v1648_v33 = vpop.f32.mrb[15].mxu0 }
0x1544   :  { %1804 = vtanh.f32 %v858_v32  ;;  %v1490_v35 = vmul.f32 -1.442695, %v858_v32 }
0x1546   :  { %1806 = vpow2.f32 %v1490_v35 }
0x154e   :  { %v1805_v34 = vpop.eup %1804 }
0x154f   :  { %871 = vrot.lane.b32.xlu0 %v1805_v34, %s1887_s5 }
0x1550   :  { %v1807_v36 = vpop.eup %1806 }
0x1551   :  { %v862_v37 = vadd.f32 1.0, %v1807_v36 }
0x1553   :  { %1808 = vrcp.f32 %v862_v37 }
0x155d   :  { %v1809_v38 = vpop.eup %1808 }
0x155e   :  { %v869_v43 = vmul.f32 %v1809_v38, %v867_v41 }
0x15c1   :  { %v872_v39 = vpop.permute.xlu0 %871 }
0x15c2   :  { %v874_v40 = vmul.f32 %v1809_v38, %v872_v39 }
0x15c4   :  { %876 = vrot.lane.b32.xlu1 %v874_v40, %s1888_s26 }
0x1636   :  { %v877_v44 = vpop.permute.xlu1 %876 }
0x1637   :  { %v879_v46 = vadd.f32 %v877_v44, %v869_v43 }
0x1639   :  { %1810 = vtanh.f32 %v879_v46  ;;  %v943_v2 = vrot.slane %v879_v46, 6 }
0x1643   :  { %v1811_v47 = vpop.eup %1810 }
0x1644   :  { %882 = vrot.lane.b32.xlu0 %v1811_v47, %s1887_s5 }
0x16b6   :  { %v883_v49 = vpop.permute.xlu0 %882 }
0x16b7   :  { %v885_v50 = vmul.f32 %v1809_v38, %v883_v49 }
0x16b9   :  { %v886_v51 = vpack.c.bf16 %v885_v50, %v885_v50 }
0x16bb   :  { %v888_v52 = vrot.slane %v886_v51, 3 }
0x16bd   :  { %889 = vrot.lane.b32.xlu1 %v888_v52, %s1888_s26 }
0x172f   :  { %v890_v53 = vpop.permute.xlu1 %889 }
0x1730   :  { %1654 = vmatmul.mubr.msk.bf16.vlgmr.msra.gmra.mrb[24].mxu1 %vm269_vm3, %v890_v53 }
0x1731   :  { %1666 = vmatpush3.bf16.msra.mxu1 %v1968_v9  ;;  %1669 = vmatprep.mubr.msk.bf16.mxu1 %vm1885_vm1, %v1884_v10 }
0x1732   :  { %1667 = vmatprep.subr.bf16.mxu1 %v1884_v10 }
0x1735   :  { %1668 = vmatpush3.bf16.msra.mxu1 %v1977_v11 }
0x1736   :  { %1681 = vmatprep.subr.bf16.mxu1 %v1884_v10 }
0x1803   :  { %v928_v54 = vpop.f32.mrb[24].mxu1 }
0x1804   :  { %v934_v55 = vadd.f32 %v928_v54, %v2001_v42  ;;  %v1655_v56 = vpop.f32.mrb[25].mxu1 }
0x1805   :  { %v931_v57 = vpop.f32.mrb[26].mxu1 }
0x1806   :  { %1812 = vtanh.f32 %v934_v55  ;;  %v1656_v58 = vpop.f32.mrb[27].mxu1  ;;  %v1492_v60 = vmul.f32 -1.442695, %v934_v55 }
0x1808   :  { %1814 = vpow2.f32 %v1492_v60 }
0x1810   :  { %v1813_v59 = vpop.eup %1812 }
0x1811   :  { %947 = vrot.lane.b32.xlu0 %v1813_v59, %s1887_s5 }
0x1812   :  { %v1815_v61 = vpop.eup %1814 }
0x1813   :  { %v938_v62 = vadd.f32 1.0, %v1815_v61 }
0x1815   :  { %1816 = vrcp.f32 %v938_v62 }
0x181f   :  { %v1817_v63 = vpop.eup %1816 }
0x1820   :  { %v945_v3 = vmul.f32 %v1817_v63, %v943_v2 }
0x1883   :  { %v948_v0 = vpop.permute.xlu0 %947 }
0x1884   :  { %v950_v1 = vmul.f32 %v1817_v63, %v948_v0 }
0x1886   :  { %952 = vrot.lane.b32.xlu1 %v950_v1, %s1888_s26 }
0x18f8   :  { %v953_v4 = vpop.permute.xlu1 %952 }
0x18f9   :  { %v955_v5 = vadd.f32 %v953_v4, %v945_v3 }
0x18fb   :  { %1818 = vtanh.f32 %v955_v5  ;;  %v1021_v26 = vrot.slane %v955_v5, 6 }
0x1905   :  { %v1819_v6 = vpop.eup %1818 }
0x1906   :  { %958 = vrot.lane.b32.xlu0 %v1819_v6, %s1887_s5 }
0x1978   :  { %v959_v7 = vpop.permute.xlu0 %958 }
0x1979   :  { %v961_v8 = vmul.f32 %v1817_v63, %v959_v7 }
0x197b   :  { %v962_v12 = vpack.c.bf16 %v961_v8, %v961_v8 }
0x197d   :  { %964 = vrot.lane.b32.xlu1 %v962_v12, %s1888_s26 }
0x19ef   :  { %v965_v13 = vpop.permute.xlu1 %964 }
0x19f0   :  { %1662 = vmatmul.mubr.msk.bf16.vlgmr.msra.gmra.mrb[16].mxu0 %vm269_vm3, %v965_v13 }
0x19f1   :  { %1674 = vmatpush3.bf16.msra.mxu0 %v1968_v9  ;;  %1677 = vmatprep.mubr.msk.bf16.mxu0 %vm1885_vm1, %v1884_v10 }
0x19f2   :  { %1675 = vmatprep.subr.bf16.mxu0 %v1884_v10 }
0x19f5   :  { %1676 = vmatpush3.bf16.msra.mxu0 %v1977_v11 }
0x19f6   :  { %1689 = vmatprep.subr.bf16.mxu0 %v1884_v10 }
0x1ac3   :  { %v1003_v48 = vpop.f32.mrb[16].mxu0 }
0x1ac4   :  { %v1010_v14 = vrot.slane %v1003_v48, 6  ;;  %v1663_v15 = vpop.f32.mrb[17].mxu0 }
0x1ac5   :  { %v1006_v16 = vpop.f32.mrb[18].mxu0 }
0x1ac6   :  { %v1012_v17 = vadd.f32 %v1010_v14, %v2001_v42  ;;  %v1664_v18 = vpop.f32.mrb[19].mxu0 }
0x1ac8   :  { %1820 = vtanh.f32 %v1012_v17  ;;  %v1494_v20 = vmul.f32 -1.442695, %v1012_v17 }
0x1aca   :  { %1822 = vpow2.f32 %v1494_v20 }
0x1ad2   :  { %v1821_v19 = vpop.eup %1820 }
0x1ad3   :  { %1025 = vrot.lane.b32.xlu0 %v1821_v19, %s1887_s5 }
0x1ad4   :  { %v1823_v21 = vpop.eup %1822 }
0x1ad5   :  { %v1016_v22 = vadd.f32 1.0, %v1823_v21 }
0x1ad7   :  { %1824 = vrcp.f32 %v1016_v22 }
0x1ae1   :  { %v1825_v23 = vpop.eup %1824 }
0x1ae2   :  { %v1023_v27 = vmul.f32 %v1825_v23, %v1021_v26 }
0x1b45   :  { %v1026_v24 = vpop.permute.xlu0 %1025 }
0x1b46   :  { %v1028_v25 = vmul.f32 %v1825_v23, %v1026_v24 }
0x1b48   :  { %1030 = vrot.lane.b32.xlu1 %v1028_v25, %s1888_s26 }
0x1bba   :  { %v1031_v28 = vpop.permute.xlu1 %1030 }
0x1bbb   :  { %v1033_v29 = vadd.f32 %v1031_v28, %v1023_v27 }
0x1bbd   :  { %1826 = vtanh.f32 %v1033_v29  ;;  %v1100_v52 = vrot.slane %v1033_v29, 6 }
0x1bc7   :  { %v1827_v30 = vpop.eup %1826 }
0x1bc8   :  { %1036 = vrot.lane.b32.xlu0 %v1827_v30, %s1887_s5 }
0x1c3a   :  { %v1037_v31 = vpop.permute.xlu0 %1036 }
0x1c3b   :  { %v1039_v32 = vmul.f32 %v1825_v23, %v1037_v31 }
0x1c3d   :  { %v1040_v33 = vpack.c.bf16 %v1039_v32, %v1039_v32 }
0x1c3f   :  { %v1042_v34 = vrot.slane %v1040_v33, 1 }
0x1c41   :  { %1043 = vrot.lane.b32.xlu1 %v1042_v34, %s1888_s26 }
0x1cb3   :  { %v1044_v35 = vpop.permute.xlu1 %1043 }
0x1cb4   :  { %1670 = vmatmul.mubr.msk.bf16.vlgmr.msra.gmra.mrb[28].mxu1 %vm269_vm3, %v1044_v35 }
0x1cb5   :  { %1682 = vmatpush3.bf16.msra.mxu1 %v1968_v9  ;;  %1685 = vmatprep.mubr.msk.bf16.mxu1 %vm1885_vm1, %v1884_v10 }
0x1cb6   :  { %1683 = vmatprep.subr.bf16.mxu1 %v1884_v10 }
0x1cb9   :  { %1684 = vmatpush3.bf16.msra.mxu1 %v1977_v11 }
0x1d87   :  { %v1082_v36 = vpop.f32.mrb[28].mxu1 }
0x1d88   :  { %v1089_v37 = vrot.slane %v1082_v36, 4  ;;  %v1671_v38 = vpop.f32.mrb[29].mxu1 }
0x1d89   :  { %v1085_v39 = vpop.f32.mrb[30].mxu1 }
0x1d8a   :  { %v1091_v40 = vadd.f32 %v1089_v37, %v2001_v42  ;;  %v1672_v41 = vpop.f32.mrb[31].mxu1 }
0x1d8c   :  { %1828 = vtanh.f32 %v1091_v40  ;;  %v1496_v44 = vmul.f32 -1.442695, %v1091_v40 }
0x1d8e   :  { %1830 = vpow2.f32 %v1496_v44 }
0x1d96   :  { %v1829_v43 = vpop.eup %1828 }
0x1d97   :  { %1104 = vrot.lane.b32.xlu0 %v1829_v43, %s1887_s5 }
0x1d98   :  { %v1831_v46 = vpop.eup %1830 }
0x1d99   :  { %v1095_v47 = vadd.f32 1.0, %v1831_v46 }
0x1d9b   :  { %1832 = vrcp.f32 %v1095_v47 }
0x1da5   :  { %v1833_v49 = vpop.eup %1832 }
0x1da6   :  { %v1102_v53 = vmul.f32 %v1833_v49, %v1100_v52 }
0x1e09   :  { %v1105_v50 = vpop.permute.xlu0 %1104 }
0x1e0a   :  { %v1107_v51 = vmul.f32 %v1833_v49, %v1105_v50 }
0x1e0c   :  { %1109 = vrot.lane.b32.xlu1 %v1107_v51, %s1888_s26 }
0x1e7e   :  { %v1110_v54 = vpop.permute.xlu1 %1109 }
0x1e7f   :  { %v1112_v55 = vadd.f32 %v1110_v54, %v1102_v53 }
0x1e81   :  { %1834 = vtanh.f32 %v1112_v55 }
0x1e8b   :  { %v1835_v56 = vpop.eup %1834 }
0x1e8c   :  { %1115 = vrot.lane.b32.xlu0 %v1835_v56, %s1887_s5 }
0x1efe   :  { %v1116_v57 = vpop.permute.xlu0 %1115 }
0x1eff   :  { %v1118_v58 = vmul.f32 %v1833_v49, %v1116_v57 }
0x1f01   :  { %v1119_v59 = vpack.c.bf16 %v1118_v58, %v1118_v58 }
0x1f03   :  { %v1121_v60 = vrot.slane %v1119_v59, 2 }
0x1f05   :  { %1122 = vrot.lane.b32.xlu1 %v1121_v60, %s1888_s26  ;;  %v1353_v60 = vld [vmem:[%s2192_s6 + $0x8] sm:$0xff] }
0x1f77   :  { %v1123_v61 = vpop.permute.xlu1 %1122 }
0x1f78   :  { %1678 = vmatmul.mubr.msk.bf16.vlgmr.msra.gmra.mrb[20].mxu0 %vm269_vm3, %v1123_v61  ;;  %v1354_v61 = vld [vmem:[%s2192_s6 + $0x10] sm:$0xff] }
0x1f79   :  { %1690 = vmatpush3.bf16.msra.mxu0 %v1968_v9  ;;  %1693 = vmatprep.mubr.msk.bf16.mxu0 %vm1885_vm1, %v1884_v10 }
0x1f7a   :  { %1691 = vmatprep.subr.bf16.mxu0 %v1884_v10 }
0x1f7d   :  { %1692 = vmatpush3.bf16.msra.mxu0 %v1977_v11  ;;  %v1179_v11 = vrot.slane %v1112_v55, 6 }
0x204b   :  { %v1161_v62 = vpop.f32.mrb[20].mxu0 }
0x204c   :  { %v1168_v63 = vrot.slane %v1161_v62, 2  ;;  %v1679_v0 = vpop.f32.mrb[21].mxu0  ;;  %v1889_v62 = vmov 0.0|0.0  }
0x204d   :  { %v1164_v1 = vpop.f32.mrb[22].mxu0  ;;  %1708 = vmatprep.subr.bf16.mxu1 %v1889_v62  ;;  %v1355_v0 = vld [vmem:[%s2192_s6 + $0x18] sm:$0xff] }
0x204e   :  { %v1170_v2 = vadd.f32 %v1168_v63, %v2001_v42  ;;  %v1680_v3 = vpop.f32.mrb[23].mxu0  ;;  %v1712_v1 = vpack.c.bf16 %v1355_v0, %v1354_v61 }
0x2050   :  { %1836 = vtanh.f32 %v1170_v2  ;;  %v1498_v5 = vmul.f32 -1.442695, %v1170_v2 }
0x2052   :  { %1838 = vpow2.f32 %v1498_v5 }
0x205a   :  { %v1837_v4 = vpop.eup %1836 }
0x205b   :  { %1183 = vrot.lane.b32.xlu0 %v1837_v4, %s1887_s5 }
0x205c   :  { %v1839_v9 = vpop.eup %1838 }
0x205d   :  { %v1174_v6 = vadd.f32 1.0, %v1839_v9 }
0x205f   :  { %1840 = vrcp.f32 %v1174_v6  ;;  %v1503_v6 = vld [vmem:[%s2193_s7] ss:$0 sm:$0xff] }
0x2069   :  { %v1841_v7 = vpop.eup %1840 }
0x206a   :  { %v1181_v13 = vmul.f32 %v1841_v7, %v1179_v11 }
0x20cd   :  { %v1184_v8 = vpop.permute.xlu0 %1183 }
0x20ce   :  { %v1186_v12 = vmul.f32 %v1841_v7, %v1184_v8 }
0x20d0   :  { %1188 = vrot.lane.b32.xlu1 %v1186_v12, %s1888_s26 }
0x2142   :  { %v1189_v48 = vpop.permute.xlu1 %1188 }
0x2143   :  { %v1191_v14 = vadd.f32 %v1189_v48, %v1181_v13 }
0x2145   :  { %1842 = vtanh.f32 %v1191_v14 }
0x214f   :  { %v1843_v42 = vpop.eup %1842 }
0x2150   :  { %1194 = vrot.lane.b32.xlu0 %v1843_v42, %s1887_s5 }
0x21c2   :  { %v1195_v15 = vpop.permute.xlu0 %1194 }
0x21c3   :  { %v1197_v16 = vmul.f32 %v1841_v7, %v1195_v15 }
0x21c5   :  { %v1198_v17 = vpack.c.bf16 %v1197_v16, %v1197_v16 }
0x21c7   :  { %v1200_v18 = vrot.slane %v1198_v17, 3 }
0x21c9   :  { %1201 = vrot.lane.b32.xlu1 %v1200_v18, %s1888_s26 }
0x223b   :  { %v1202_v19 = vpop.permute.xlu1 %1201 }
0x223c   :  { %1686 = vmatmul.mubr.msk.bf16.vlgmr.msra.gmra.mrb[32].mxu1 %vm269_vm3, %v1202_v19 }
0x223d   :  { %1705 = vmatprep.mubr.msk.f32.mxu1 %vm1885_vm1, %v1884_v10  ;;  %v1255_v10 = vrot.slane %v1191_v14, 6 }
0x230f   :  { %v1240_v20 = vpop.f32.mrb[32].mxu1 }
0x2310   :  { %v1246_v21 = vadd.f32 %v1240_v20, %v2003_v45  ;;  %v1687_v22 = vpop.f32.mrb[33].mxu1 }
0x2311   :  { %v1243_v23 = vpop.f32.mrb[34].mxu1 }
0x2312   :  { %1844 = vtanh.f32 %v1246_v21  ;;  %v1688_v24 = vpop.f32.mrb[35].mxu1  ;;  %v1500_v26 = vmul.f32 -1.442695, %v1246_v21 }
0x2314   :  { %1846 = vpow2.f32 %v1500_v26 }
0x231c   :  { %v1845_v25 = vpop.eup %1844 }
0x231d   :  { %1259 = vrot.lane.b32.xlu0 %v1845_v25, %s1887_s5 }
0x231e   :  { %v1847_v27 = vpop.eup %1846 }
0x231f   :  { %v1250_v28 = vadd.f32 1.0, %v1847_v27 }
0x2321   :  { %1848 = vrcp.f32 %v1250_v28 }
0x232b   :  { %v1849_v29 = vpop.eup %1848 }
0x232c   :  { %v1257_v32 = vmul.f32 %v1849_v29, %v1255_v10 }
0x238f   :  { %v1260_v30 = vpop.permute.xlu0 %1259 }
0x2390   :  { %v1262_v31 = vmul.f32 %v1849_v29, %v1260_v30 }
0x2392   :  { %1264 = vrot.lane.b32.xlu1 %v1262_v31, %s1888_s26 }
0x2404   :  { %v1265_v33 = vpop.permute.xlu1 %1264 }
0x2405   :  { %v1267_v34 = vadd.f32 %v1265_v33, %v1257_v32 }
0x2407   :  { %1850 = vtanh.f32 %v1267_v34  ;;  %v1333_v56 = vrot.slane %v1267_v34, 6 }
0x2411   :  { %v1851_v35 = vpop.eup %1850 }
0x2412   :  { %1270 = vrot.lane.b32.xlu0 %v1851_v35, %s1887_s5 }
0x2484   :  { %v1271_v36 = vpop.permute.xlu0 %1270 }
0x2485   :  { %v1273_v37 = vmul.f32 %v1849_v29, %v1271_v36 }
0x2487   :  { %v1274_v38 = vpack.c.bf16 %v1273_v37, %v1273_v37 }
0x2489   :  { %1276 = vrot.lane.b32.xlu1 %v1274_v38, %s1888_s26 }
0x24fb   :  { %v1277_v39 = vpop.permute.xlu1 %1276 }
0x24fc   :  { %1694 = vmatmul.mubr.msk.bf16.vlgmr.msra.gmra.mrb[24].mxu0 %vm269_vm3, %v1277_v39 }
0x25cf   :  { %v1315_v40 = vpop.f32.mrb[24].mxu0 }
0x25d0   :  { %v1322_v41 = vrot.slane %v1315_v40, 6  ;;  %v1695_v43 = vpop.f32.mrb[25].mxu0 }
0x25d1   :  { %v1318_v44 = vpop.f32.mrb[26].mxu0 }
0x25d2   :  { %v1324_v46 = vadd.f32 %v1322_v41, %v2003_v45  ;;  %v1696_v47 = vpop.f32.mrb[27].mxu0  ;;  %v1352_v45 = vld [vmem:[%s2192_s6] sm:$0xff]  ;;  %s1890_s6 = smov [#allocation2]  }
0x25d3   :  { %v1709_v63 = vpack.c.bf16 %v1353_v60, %v1352_v45  ;;  %s1447_s15 = sshll.u32 %s1890_s6, 4  ;;  %s1448_s15 = int_to_ptr.vmem [resolvable:$true] %s1447_s15 }
0x25d4   :  { %1852 = vtanh.f32 %v1324_v46  ;;  %v1502_v50 = vmul.f32 -1.442695, %v1324_v46  ;;  %s1860_s16 = scalar_lea.vmem %s1448_s15, 32  ;;  %p1865_p1 = scmp.lt.s32.totalorder %s1448_s15, %s1448_s15 }
0x25d5   :  { %1710 = vmatpush3.bf16.msra.mxu1 %v1709_v63  ;;  %p1861_p0 = scmp.ne.s32.totalorder %s1448_s15, %s1860_s16  ;;  %p1866_p2 = scmp.lt.s32.totalorder %s1860_s16, %s1860_s16 }
0x25d6   :  { %1854 = vpow2.f32 %v1502_v50  ;;  %1711 = vmatprep.subr.bf16.mxu1 %v1889_v62 }
0x25d7   :  { %p1867_p3 = por %p1866_p2, %p1865_p1 }
0x25d9   :  { %1713 = vmatpush3.bf16.msra.mxu1 %v1712_v1  ;;  %p1868_p4 = pnand %p1867_p3, %p1861_p0 }
0x25de   :  { %v1853_v49 = vpop.eup %1852 }
0x25df   :  { %1337 = vrot.lane.b32.xlu0 %v1853_v49, %s1887_s5 }
0x25e0   :  { %v1855_v51 = vpop.eup %1854 }
0x25e1   :  { %v1328_v52 = vadd.f32 1.0, %v1855_v51 }
0x25e3   :  { %1856 = vrcp.f32 %v1328_v52 }
0x25ed   :  { %v1857_v53 = vpop.eup %1856 }
0x25ee   :  { %v1335_v57 = vmul.f32 %v1857_v53, %v1333_v56 }
0x2651   :  { %v1338_v54 = vpop.permute.xlu0 %1337 }
0x2652   :  { %v1340_v55 = vmul.f32 %v1857_v53, %v1338_v54 }
0x2654   :  { %1342 = vrot.lane.b32.xlu1 %v1340_v55, %s1888_s26 }
0x26c6   :  { %v1343_v58 = vpop.permute.xlu1 %1342 }
0x26c7   :  { %v1345_v59 = vadd.f32 %v1343_v58, %v1335_v57 }
0x26c9   :  { %1858 = vtanh.f32 %v1345_v59 }
0x26d3   :  { %v1859_v2 = vpop.eup %1858 }
0x26d4   :  { %1348 = vrot.lane.b32.xlu0 %v1859_v2, %s1887_s5 }
0x2746   :  { %v1349_v3 = vpop.permute.xlu0 %1348 }
0x2747   :  { %v1351_v4 = vmul.f32 %v1857_v53, %v1349_v3 }
0x2749   :  { %v1364_v5 = vrot.slane %v1351_v4, 2 }
0x274b   :  { %1365 = vrot.lane.b32.xlu1 %v1364_v5, %s1888_s26 }
0x27bd   :  { %v1366_v9 = vpop.permute.xlu1 %1365 }
0x27be   :  { %1706 = vmatmul.mubr.msk.f32.vlgmr.msra.gmra.mrb[36].mxu1 %vm269_vm3, %v1366_v9 }
0x2891   :  { %v1435_v7 = vpop.f32.mrb[36].mxu1 }
0x2892   :  { %v1436_v8 = vadd.f32 %v1503_v6, %v1435_v7  ;;  %v1707_v12 = vpop.f32.mrb[37].mxu1 }
0x2894   :  { %1440 = vst.msk [vmem:[#allocation2] sm:$0x3] %vm1439_vm4, %v1436_v8 }
0x2895   :  { %1871 = shalt.err (!%p1868_p4)
}
0x2896   :  { %s1872_s19 = scalar_lea.hbm %s2194_s8, 32 }
0x2897   :  { %p1873_p5 = scmp.ne.s32.totalorder %s2194_s8, %s1872_s19  ;;  %p1876_p6 = scmp.lt.u32.totalorder %s1872_s19, %s2194_s8 }
0x2899   :  { %p1878_p7 = pnand %p1876_p6, %p1873_p5 }
0x289b   :  { %1881 = shalt.err (!%p1878_p7)
}
0x289c   :  { %1450 = dma.vmem_to_hbm [thread:$0]  %s1448_s15, 32, %s2194_s8, [#allocation3]  }
0x289d   :  { %1882 = dma.done.wait [#allocation3], 32  }
0x289e   :  { %1883 = vsyncadd [#allocation3], 4294967264 }
0x289f   :  { %1454 = vsyncpa [#allocation3], 1 }

</bundles_post_ra>
